<compile_context>
chip_gen: v5e
topology: v5e:2x2
jax: 0.10.0
libtpu: 0.0.40
codegen_flags: <defaults>
</compile_context>

<pallas_src>
import functools

import jax
import jax.numpy as jnp
from jax.experimental import pallas as pl
from jax.experimental.pallas import tpu as pltpu

LANES = 128
SMALL_INPUT_BYTES = 1 << 20  # below ~1 MiB per input, plain XLA wins


def _round_up(x, m):
    return ((x + m - 1) // m) * m


def _tpu_tiling_config():
    """Returns (max_tile_rows, vmem_limit_cap_bytes, force_two_way_split)."""
    kind = ""
    try:
        kind = jax.devices()[0].device_kind.lower()
    except Exception:
        pass
    if ("v7" in kind) or ("7x" in kind):
        # v7x: 3.2 TB/s HBM, 64 MiB VMEM/TC, 2 TCs -> big blocks + balanced grid.
        return 16384, 48 << 20, True
    if "v6" in kind:
        # v6e: 128 MiB physical VMEM, single TC.
        return 8192, 64 << 20, False
    if "v5" in kind:
        # v5e: 2 MiB-per-input blocks already sit at the HBM roofline.
        return 4096, 32 << 20, False
    return 4096, 32 << 20, False  # unknown: conservative


def _mse_partial_kernel(out_ref, tgt_ref, psum_ref, *, total_rows, needs_mask):
    """One grid step: (8, 128) partial sums of squared diffs for this row block."""
    d = out_ref[...].astype(jnp.float32) - tgt_ref[...].astype(jnp.float32)
    d2 = d * d
    tile_rows = d2.shape[0]
    if needs_mask:
        # Only the last block can be partial; rows past `total_rows` hold
        # unspecified data and must be zeroed (select, so NaN/Inf is fine).
        row_ids = jax.lax.broadcasted_iota(jnp.int32, d2.shape, 0)
        valid = (row_ids + pl.program_id(0) * tile_rows) < total_rows
        d2 = jnp.where(valid, d2, 0.0)
    # (tile_rows, 128) -> (tile_rows//8, 8, 128) is a pure sublane re-tiling
    # (free); reducing over axis 0 is vreg-wise VPU adds, no cross-lane work.
    psum_ref[...] = jnp.sum(d2.reshape(tile_rows // 8, 8, LANES), axis=0)


def mse_loss(out, target, weight=None):
    """MSE loss with 'mean' reduction (weight is ignored, like the reference)."""
    assert out.shape == target.shape, "out/target must have identical shapes"
    n_elems = out.size
    rem = n_elems % LANES
    per_input_bytes = n_elems * out.dtype.itemsize

    # Fallbacks (plain fused XLA, already near the HBM roofline for this op):
    #  * tiny inputs: pallas_call launch + DMA-setup overhead dominates;
    #  * numel not a multiple of 128: a lane-dense reshape would require a full
    #    HBM copy of both inputs (~3x total traffic for a mem-bound kernel).
    if n_elems == 0 or rem != 0 or per_input_bytes < SMALL_INPUT_BYTES:
        d = out.astype(jnp.float32) - target.astype(jnp.float32)
        return jnp.mean(d * d)

    rows = n_elems // LANES
    # Contiguous ravel + reshape: free (no HBM copy).
    slab_out = jnp.ravel(out).reshape(rows, LANES)
    slab_tgt = jnp.ravel(target).reshape(rows, LANES)

    max_tile_rows, vmem_cap, force_split = _tpu_tiling_config()

    if force_split:
        # v7x megacore: always present >= 2 balanced blocks so both TensorCores
        # stream disjoint halves of the data.
        tile_rows = min(max_tile_rows, _round_up(pl.cdiv(rows, 2), 8))
        num_blocks = pl.cdiv(rows, tile_rows)
        if num_blocks > 1 and num_blocks % 2 == 1:
            # Odd block count leaves one core an extra block; rebalance to even.
            tile_rows = min(max_tile_rows, _round_up(pl.cdiv(rows, num_blocks + 1), 8))
            num_blocks = pl.cdiv(rows, tile_rows)
    else:
        # Single TC: biggest block that fits; keep it a multiple of 8 rows so
        # the in-kernel (rows//8, 8, 128) re-tiling stays free.
        tile_rows = min(max_tile_rows, max(8, (rows // 8) * 8))
        num_blocks = pl.cdiv(rows, tile_rows)

    assert tile_rows % 8 == 0
    needs_mask = (rows % tile_rows) != 0

    kernel = functools.partial(
        _mse_partial_kernel, total_rows=rows, needs_mask=needs_mask
    )

    # 2 inputs x 2 double-buffers x block bytes + slack, clamped per generation.
    block_in_bytes = tile_rows * LANES * (out.dtype.itemsize + target.dtype.itemsize)
    vmem_limit = int(min(max(2 * block_in_bytes + (4 << 20), 16 << 20), vmem_cap))

    io_bytes = n_elems * (out.dtype.itemsize + target.dtype.itemsize)
    cost = pl.CostEstimate(
        flops=3 * n_elems,              # sub, mul, add per element
        transcendentals=0,
        bytes_accessed=io_bytes + num_blocks * 8 * LANES * 4,
    )

    partials = pl.pallas_call(
        kernel,
        out_shape=jax.ShapeDtypeStruct((num_blocks * 8, LANES), jnp.float32),
        grid=(num_blocks,),
        in_specs=[
            pl.BlockSpec((tile_rows, LANES), lambda i: (i, 0)),
            pl.BlockSpec((tile_rows, LANES), lambda i: (i, 0)),
        ],
        out_specs=pl.BlockSpec((8, LANES), lambda i: (i, 0)),
        compiler_params=pltpu.CompilerParams(
            dimension_semantics=("parallel",),  # independent blocks -> megacore ok
            vmem_limit_bytes=vmem_limit,
        ),
        cost_estimate=cost,
    )(slab_out, slab_tgt)

    return jnp.sum(partials) / jnp.float32(n_elems)


if __name__ == "__main__":
    key = jax.random.PRNGKey(0)
    ks = jax.random.split(key, 8)

    def ref_mse(a, b):
        d = a.astype(jnp.float32) - b.astype(jnp.float32)
        return jnp.mean(d * d)

    # 1) Module-sized center-map shape (NCHW): tiny-input fallback path.
    out1 = jax.random.normal(ks[0], (2, 4, 16, 16), dtype=jnp.float32)
    tgt1 = jax.random.normal(ks[1], (2, 4, 16, 16), dtype=jnp.float32)
    wgt1 = jax.random.uniform(ks[2], (2, 4, 16, 16), dtype=jnp.float32)  # ignored

    # 2) Pallas path: lane-aligned, single (or 2-way split on v7x) block.
    out2 = jax.random.normal(ks[3], (8, 8, 64, 64), dtype=jnp.float32)
    tgt2 = jax.random.normal(ks[4], (8, 8, 64, 64), dtype=jnp.float32)

    # 3) Pallas path: multiple blocks + partial last row-block (mask path).
    out3 = jax.random.normal(ks[5], (2, 2, 4101, 128), dtype=jnp.float32)
    tgt3 = jax.random.normal(ks[6], (2, 2, 4101, 128), dtype=jnp.float32)

    checks = [(out1, tgt1, wgt1), (out2, tgt2, None), (out3, tgt3, None)]
    for o, t, w in checks:
        loss = jax.block_until_ready(mse_loss(o, t, w))
        ref = jax.block_until_ready(ref_mse(o, t))
        assert jnp.allclose(loss, ref, rtol=1e-5, atol=1e-6), (o.shape, loss, ref)

    print("KERNEL_OK")
</pallas_src>

<mosaic_0001>
module attributes {stable_mosaic.version = 11 : i64} {
  func.func @_mse_partial_kernel(%arg0: i32, %arg1: memref<2048x128xf32, #tpu.memory_space<vmem>>, %arg2: memref<2048x128xf32, #tpu.memory_space<vmem>>, %arg3: memref<8x128xf32, #tpu.memory_space<vmem>>) attributes {dimension_semantics = [#tpu.dimension_semantics<parallel>], iteration_bounds = array<i64: 1>, scalar_prefetch = 0 : i64, scratch_operands = 0 : i64, tpu.core_type = #tpu.core_type<tc>, window_params = [{transform_indices = @transform_0, window_bounds = array<i64: 2048, 128>}, {transform_indices = @transform_1, window_bounds = array<i64: 2048, 128>}, {transform_indices = @transform_2, window_bounds = array<i64: 8, 128>}]} {
    %c0 = arith.constant 0 : index
    %c0_0 = arith.constant 0 : index
    %0 = vector.load %arg1[%c0, %c0_0] : memref<2048x128xf32, #tpu.memory_space<vmem>>, vector<2048x128xf32>
    %c0_1 = arith.constant 0 : index
    %c0_2 = arith.constant 0 : index
    %1 = vector.load %arg2[%c0_1, %c0_2] : memref<2048x128xf32, #tpu.memory_space<vmem>>, vector<2048x128xf32>
    %2 = arith.subf %0, %1 : vector<2048x128xf32>
    %3 = arith.mulf %2, %2 : vector<2048x128xf32>
    %4 = vector.shape_cast %3 : vector<2048x128xf32> to vector<256x8x128xf32>
    %cst = arith.constant dense<0.000000e+00> : vector<8x128xf32>
    %5 = vector.multi_reduction <add>, %4, %cst [0] : vector<256x8x128xf32> to vector<8x128xf32>
    %c0_3 = arith.constant 0 : index
    %c0_4 = arith.constant 0 : index
    %6 = vector.load %arg3[%c0_3, %c0_4] : memref<8x128xf32, #tpu.memory_space<vmem>>, vector<8x128xf32>
    tpu.vector_store %arg3[%c0_3, %c0_4], %5 {strides = array<i32>} : memref<8x128xf32, #tpu.memory_space<vmem>>, vector<8x128xf32>,
    return
  }
  func.func @transform_0(%arg0: i32) -> (i32, i32) {
    %c0_i32 = arith.constant 0 : i32
    %c0_i32_0 = arith.constant 0 : i32
    return %arg0, %c0_i32 : i32, i32
  }
  func.func @transform_1(%arg0: i32) -> (i32, i32) {
    %c0_i32 = arith.constant 0 : i32
    %c0_i32_0 = arith.constant 0 : i32
    return %arg0, %c0_i32 : i32, i32
  }
  func.func @transform_2(%arg0: i32) -> (i32, i32) {
    %c0_i32 = arith.constant 0 : i32
    %c0_i32_0 = arith.constant 0 : i32
    return %arg0, %c0_i32 : i32, i32
  }
}

</mosaic_0001>

<bundles_post_ra>
// kernel: tpu_custom_call.1
= control target key start
LH: loop header
LB: loop body
LE: loop exit
PB: predicated region body
PF: predicated region fallthrough
CT: control target
= control target key end

     0   :  { %7 = vsyncpa [#allocation3], 0  ;;  %s1454_s0 = inlined_call_operand.hbm [shape: f32[2048,128], index: 0, kind: input, shape index: {}]   ;;  %s1455_s1 = inlined_call_operand.hbm [shape: f32[2048,128], index: 1, kind: input, shape index: {}]   ;;  %s1456_s2 = inlined_call_operand.hbm [shape: f32[8,128], index: 2, kind: output, shape index: {}]  }
   0x1   :  { %8 = vsyncpa [#allocation6], 0 }
   0x2   :  { %9 = vsyncpa [#allocation4], 0  ;;  %s14_s11 = sshll.u32 %s1454_s0, 4  ;;  %s1425_s12 = smov [#allocation2]   ;;  %s15_s11 = int_to_ptr.hbm [resolvable:$true] %s14_s11 }
   0x3   :  { %s16_s13 = sshll.u32 %s1425_s12, 4  ;;  %s27_s16 = sshll.u32 %s1455_s1, 4  ;;  %s17_s13 = int_to_ptr.vmem [resolvable:$true] %s16_s13  ;;  %s28_s16 = int_to_ptr.hbm [resolvable:$true] %s27_s16 }
   0x4   :  { %s1426_s17 = smov 128   ;;  %s1427_s18 = smov 8  }
   0x5   :  { %22 = dma.hbm_to_vmem [thread:$0]  %s15_s11, 32768, %s17_s13, [#allocation3], %s1426_s17, %s1426_s17, %s1427_s18  }
   0x6   :  { %s1428_s19 = smov [#allocation5]  }
   0x7   :  { %s29_s20 = sshll.u32 %s1428_s19, 4  ;;  %s30_s20 = int_to_ptr.vmem [resolvable:$true] %s29_s20 }
   0x8   :  { %35 = dma.hbm_to_vmem [thread:$0]  %s28_s16, 32768, %s30_s20, [#allocation6], %s1426_s17, %s1426_s17, %s1427_s18  }
   0x9   :  { %1419 = dma.done.wait [#allocation3], 32768  }
   0xa   :  { %1420 = vsyncadd [#allocation3], 4294934528 }
   0xb   :  { %1421 = dma.done.wait [#allocation6], 32768  }
   0xc   :  { %1422 = vsyncadd [#allocation6], 4294934528  ;;  %v44_v0 = vld [vmem:[#allocation2] sm:$0xff]  ;;  %v45_v1 = vld [vmem:[#allocation2 + $0x8] sm:$0xff]  ;;  %s1429_s0 = smov [#allocation7]   ;;  %s1331_s23 = sshll.u32 %s1456_s2, 4  ;;  %s1332_s23 = int_to_ptr.hbm [resolvable:$true] %s1331_s23 }
   0xd   :  { %v300_v2 = vld [vmem:[#allocation5] sm:$0xff]  ;;  %v301_v3 = vld [vmem:[#allocation5 + $0x8] sm:$0xff]  ;;  %v46_v6 = vld [vmem:[#allocation2 + $0x10] sm:$0xff]  ;;  %s1329_s1 = sshll.u32 %s1429_s0, 4  ;;  %s1330_s1 = int_to_ptr.vmem [resolvable:$true] %s1329_s1 }
   0xe   :  { %v556_v4 = vsub.f32 %v44_v0, %v300_v2  ;;  %v557_v5 = vsub.f32 %v45_v1, %v301_v3  ;;  %v302_v7 = vld [vmem:[#allocation5 + $0x10] sm:$0xff]  ;;  %v47_v11 = vld [vmem:[#allocation2 + $0x18] sm:$0xff]  ;;  %v48_v16 = vld [vmem:[#allocation2 + $0x20] sm:$0xff] }
   0xf   :  { %v558_v8 = vsub.f32 %v46_v6, %v302_v7  ;;  %v303_v12 = vld [vmem:[#allocation5 + $0x18] sm:$0xff]  ;;  %v304_v17 = vld [vmem:[#allocation5 + $0x20] sm:$0xff]  ;;  %v49_v21 = vld [vmem:[#allocation2 + $0x28] sm:$0xff] }
  0x10   :  { %v812_v9 = vmul.f32 %v556_v4, %v556_v4  ;;  %v813_v10 = vmul.f32 %v557_v5, %v557_v5  ;;  %v559_v13 = vsub.f32 %v47_v11, %v303_v12  ;;  %v560_v18 = vsub.f32 %v48_v16, %v304_v17  ;;  %v305_v22 = vld [vmem:[#allocation5 + $0x28] sm:$0xff]  ;;  %v50_v26 = vld [vmem:[#allocation2 + $0x30] sm:$0xff]  ;;  %v51_v31 = vld [vmem:[#allocation2 + $0x38] sm:$0xff] }
  0x11   :  { %v814_v14 = vmul.f32 %v558_v8, %v558_v8  ;;  %v561_v23 = vsub.f32 %v49_v21, %v305_v22  ;;  %v306_v27 = vld [vmem:[#allocation5 + $0x30] sm:$0xff]  ;;  %v307_v32 = vld [vmem:[#allocation5 + $0x38] sm:$0xff]  ;;  %v52_v36 = vld [vmem:[#allocation2 + $0x40] sm:$0xff] }
  0x12   :  { %v1068_v15 = vadd.f32 %v813_v10, %v812_v9  ;;  %v815_v19 = vmul.f32 %v559_v13, %v559_v13  ;;  %v816_v24 = vmul.f32 %v560_v18, %v560_v18  ;;  %v562_v28 = vsub.f32 %v50_v26, %v306_v27  ;;  %v308_v37 = vld [vmem:[#allocation5 + $0x40] sm:$0xff]  ;;  %v53_v41 = vld [vmem:[#allocation2 + $0x48] sm:$0xff]  ;;  %v54_v46 = vld [vmem:[#allocation2 + $0x50] sm:$0xff] }
  0x13   :  { %v817_v29 = vmul.f32 %v561_v23, %v561_v23  ;;  %v563_v33 = vsub.f32 %v51_v31, %v307_v32  ;;  %v564_v38 = vsub.f32 %v52_v36, %v308_v37  ;;  %v309_v42 = vld [vmem:[#allocation5 + $0x48] sm:$0xff]  ;;  %v310_v47 = vld [vmem:[#allocation5 + $0x50] sm:$0xff]  ;;  %v55_v51 = vld [vmem:[#allocation2 + $0x58] sm:$0xff] }
  0x14   :  { %v1069_v20 = vadd.f32 %v1068_v15, %v814_v14  ;;  %v818_v34 = vmul.f32 %v562_v28, %v562_v28  ;;  %v565_v43 = vsub.f32 %v53_v41, %v309_v42  ;;  %v566_v48 = vsub.f32 %v54_v46, %v310_v47  ;;  %v311_v52 = vld [vmem:[#allocation5 + $0x58] sm:$0xff]  ;;  %v56_v56 = vld [vmem:[#allocation2 + $0x60] sm:$0xff]  ;;  %v57_v61 = vld [vmem:[#allocation2 + $0x68] sm:$0xff] }
  0x15   :  { %v819_v39 = vmul.f32 %v563_v33, %v563_v33  ;;  %v820_v44 = vmul.f32 %v564_v38, %v564_v38  ;;  %v567_v53 = vsub.f32 %v55_v51, %v311_v52  ;;  %v312_v57 = vld [vmem:[#allocation5 + $0x60] sm:$0xff]  ;;  %v313_v62 = vld [vmem:[#allocation5 + $0x68] sm:$0xff]  ;;  %v58_v2 = vld [vmem:[#allocation2 + $0x70] sm:$0xff] }
  0x16   :  { %v1070_v25 = vadd.f32 %v1069_v20, %v815_v19  ;;  %v821_v49 = vmul.f32 %v565_v43, %v565_v43  ;;  %v822_v54 = vmul.f32 %v566_v48, %v566_v48  ;;  %v568_v58 = vsub.f32 %v56_v56, %v312_v57  ;;  %v314_v3 = vld [vmem:[#allocation5 + $0x70] sm:$0xff]  ;;  %v59_v7 = vld [vmem:[#allocation2 + $0x78] sm:$0xff]  ;;  %v60_v12 = vld [vmem:[#allocation2 + $0x80] sm:$0xff] }
  0x17   :  { %v823_v59 = vmul.f32 %v567_v53, %v567_v53  ;;  %v569_v63 = vsub.f32 %v57_v61, %v313_v62  ;;  %v570_v4 = vsub.f32 %v58_v2, %v314_v3  ;;  %v315_v8 = vld [vmem:[#allocation5 + $0x78] sm:$0xff]  ;;  %v316_v13 = vld [vmem:[#allocation5 + $0x80] sm:$0xff]  ;;  %v61_v17 = vld [vmem:[#allocation2 + $0x88] sm:$0xff] }
  0x18   :  { %v1071_v30 = vadd.f32 %v1070_v25, %v816_v24  ;;  %v824_v0 = vmul.f32 %v568_v58, %v568_v58  ;;  %v571_v9 = vsub.f32 %v59_v7, %v315_v8  ;;  %v572_v14 = vsub.f32 %v60_v12, %v316_v13  ;;  %v317_v18 = vld [vmem:[#allocation5 + $0x88] sm:$0xff]  ;;  %v62_v22 = vld [vmem:[#allocation2 + $0x90] sm:$0xff]  ;;  %v63_v27 = vld [vmem:[#allocation2 + $0x98] sm:$0xff] }
  0x19   :  { %v825_v5 = vmul.f32 %v569_v63, %v569_v63  ;;  %v826_v10 = vmul.f32 %v570_v4, %v570_v4  ;;  %v573_v19 = vsub.f32 %v61_v17, %v317_v18  ;;  %v318_v23 = vld [vmem:[#allocation5 + $0x90] sm:$0xff]  ;;  %v319_v28 = vld [vmem:[#allocation5 + $0x98] sm:$0xff]  ;;  %v64_v32 = vld [vmem:[#allocation2 + $0xa0] sm:$0xff] }
  0x1a   :  { %v1072_v35 = vadd.f32 %v1071_v30, %v817_v29  ;;  %v827_v15 = vmul.f32 %v571_v9, %v571_v9  ;;  %v828_v20 = vmul.f32 %v572_v14, %v572_v14  ;;  %v574_v24 = vsub.f32 %v62_v22, %v318_v23  ;;  %v320_v33 = vld [vmem:[#allocation5 + $0xa0] sm:$0xff]  ;;  %v65_v37 = vld [vmem:[#allocation2 + $0xa8] sm:$0xff]  ;;  %v70_v56 = vld [vmem:[#allocation2 + $0xd0] sm:$0xff] }
  0x1b   :  { %v829_v25 = vmul.f32 %v573_v19, %v573_v19  ;;  %v575_v29 = vsub.f32 %v63_v27, %v319_v28  ;;  %v321_v38 = vld [vmem:[#allocation5 + $0xa8] sm:$0xff]  ;;  %v68_v47 = vld [vmem:[#allocation2 + $0xc0] sm:$0xff]  ;;  %v326_v57 = vld [vmem:[#allocation5 + $0xd0] sm:$0xff] }
  0x1c   :  { %v1073_v40 = vadd.f32 %v1072_v35, %v818_v34  ;;  %v830_v30 = vmul.f32 %v574_v24, %v574_v24  ;;  %v576_v34 = vsub.f32 %v64_v32, %v320_v33  ;;  %v577_v41 = vsub.f32 %v65_v37, %v321_v38  ;;  %v324_v48 = vld [vmem:[#allocation5 + $0xc0] sm:$0xff]  ;;  %v69_v52 = vld [vmem:[#allocation2 + $0xc8] sm:$0xff]  ;;  %v71_v61 = vld [vmem:[#allocation2 + $0xd8] sm:$0xff] }
  0x1d   :  { %v831_v35 = vmul.f32 %v575_v29, %v575_v29  ;;  %v325_v53 = vld [vmem:[#allocation5 + $0xc8] sm:$0xff]  ;;  %v327_v62 = vld [vmem:[#allocation5 + $0xd8] sm:$0xff]  ;;  %v582_v63 = vsub.f32 %v70_v56, %v326_v57  ;;  %v72_v2 = vld [vmem:[#allocation2 + $0xe0] sm:$0xff] }
  0x1e   :  { %v1074_v45 = vadd.f32 %v1073_v40, %v819_v39  ;;  %v66_v39 = vld [vmem:[#allocation2 + $0xb0] sm:$0xff]  ;;  %v832_v42 = vmul.f32 %v576_v34, %v576_v34  ;;  %v581_v58 = vsub.f32 %v69_v52, %v325_v53  ;;  %v328_v3 = vld [vmem:[#allocation5 + $0xe0] sm:$0xff]  ;;  %v583_v4 = vsub.f32 %v71_v61, %v327_v62  ;;  %v73_v7 = vld [vmem:[#allocation2 + $0xe8] sm:$0xff] }
  0x1f   :  { %v322_v40 = vld [vmem:[#allocation5 + $0xb0] sm:$0xff]  ;;  %v329_v8 = vld [vmem:[#allocation5 + $0xe8] sm:$0xff]  ;;  %v584_v9 = vsub.f32 %v72_v2, %v328_v3  ;;  %v75_v17 = vld [vmem:[#allocation2 + $0xf8] sm:$0xff] }
  0x20   :  { %v1075_v50 = vadd.f32 %v1074_v45, %v820_v44  ;;  %v67_v44 = vld [vmem:[#allocation2 + $0xb8] sm:$0xff]  ;;  %v578_v46 = vsub.f32 %v66_v39, %v322_v40  ;;  %v74_v12 = vld [vmem:[#allocation2 + $0xf0] sm:$0xff]  ;;  %v585_v14 = vsub.f32 %v73_v7, %v329_v8  ;;  %v76_v22 = vld [vmem:[#allocation2 + $0x100] sm:$0xff] }
  0x21   :  { %v323_v45 = vld [vmem:[#allocation5 + $0xb8] sm:$0xff]  ;;  %v330_v13 = vld [vmem:[#allocation5 + $0xf0] sm:$0xff]  ;;  %v332_v23 = vld [vmem:[#allocation5 + $0x100] sm:$0xff] }
  0x22   :  { %v1076_v55 = vadd.f32 %v1075_v50, %v821_v49  ;;  %v579_v49 = vsub.f32 %v67_v44, %v323_v45  ;;  %v833_v50 = vmul.f32 %v577_v41, %v577_v41  ;;  %v331_v18 = vld [vmem:[#allocation5 + $0xf8] sm:$0xff]  ;;  %v586_v19 = vsub.f32 %v74_v12, %v330_v13  ;;  %v77_v27 = vld [vmem:[#allocation2 + $0x108] sm:$0xff]  ;;  %v78_v32 = vld [vmem:[#allocation2 + $0x110] sm:$0xff] }
  0x23   :  { %v587_v24 = vsub.f32 %v75_v17, %v331_v18  ;;  %v333_v28 = vld [vmem:[#allocation5 + $0x108] sm:$0xff]  ;;  %v588_v29 = vsub.f32 %v76_v22, %v332_v23  ;;  %v334_v33 = vld [vmem:[#allocation5 + $0x110] sm:$0xff]  ;;  %v79_v37 = vld [vmem:[#allocation2 + $0x118] sm:$0xff] }
  0x24   :  { %v1077_v60 = vadd.f32 %v1076_v55, %v822_v54  ;;  %v580_v54 = vsub.f32 %v68_v47, %v324_v48  ;;  %v834_v55 = vmul.f32 %v578_v46, %v578_v46  ;;  %v589_v34 = vsub.f32 %v77_v27, %v333_v28  ;;  %v335_v38 = vld [vmem:[#allocation5 + $0x118] sm:$0xff]  ;;  %v81_v47 = vld [vmem:[#allocation2 + $0x128] sm:$0xff]  ;;  %v82_v52 = vld [vmem:[#allocation2 + $0x130] sm:$0xff] }
  0x25   :  { %v590_v39 = vsub.f32 %v78_v32, %v334_v33  ;;  %v844_v40 = vmul.f32 %v588_v29, %v588_v29  ;;  %v591_v44 = vsub.f32 %v79_v37, %v335_v38  ;;  %v337_v48 = vld [vmem:[#allocation5 + $0x128] sm:$0xff]  ;;  %v338_v53 = vld [vmem:[#allocation5 + $0x130] sm:$0xff]  ;;  %v83_v57 = vld [vmem:[#allocation2 + $0x138] sm:$0xff] }
  0x26   :  { %v1078_v1 = vadd.f32 %v1077_v60, %v823_v59  ;;  %v835_v59 = vmul.f32 %v579_v49, %v579_v49  ;;  %v845_v45 = vmul.f32 %v589_v34, %v589_v34  ;;  %v84_v62 = vld [vmem:[#allocation2 + $0x140] sm:$0xff]  ;;  %v85_v3 = vld [vmem:[#allocation2 + $0x148] sm:$0xff]  ;;  %v86_v8 = vld [vmem:[#allocation2 + $0x150] sm:$0xff] }
  0x27   :  { %v87_v13 = vld [vmem:[#allocation2 + $0x158] sm:$0xff]  ;;  %v88_v18 = vld [vmem:[#allocation2 + $0x160] sm:$0xff]  ;;  %v89_v23 = vld [vmem:[#allocation2 + $0x168] sm:$0xff] }
  0x28   :  { %v1079_v6 = vadd.f32 %v1078_v1, %v824_v0  ;;  %v836_v0 = vmul.f32 %v580_v54, %v580_v54  ;;  %v593_v54 = vsub.f32 %v81_v47, %v337_v48  ;;  %v90_v28 = vld [vmem:[#allocation2 + $0x170] sm:$0xff]  ;;  %v91_v33 = vld [vmem:[#allocation2 + $0x178] sm:$0xff]  ;;  %v92_v38 = vld [vmem:[#allocation2 + $0x180] sm:$0xff] }
  0x29   :  { %v346_v29 = vld [vmem:[#allocation5 + $0x170] sm:$0xff]  ;;  %v347_v34 = vld [vmem:[#allocation5 + $0x178] sm:$0xff] }
  0x2a   :  { %v1080_v11 = vadd.f32 %v1079_v6, %v825_v5  ;;  %v837_v5 = vmul.f32 %v581_v58, %v581_v58  ;;  %v339_v58 = vld [vmem:[#allocation5 + $0x138] sm:$0xff]  ;;  %v94_v48 = vld [vmem:[#allocation2 + $0x190] sm:$0xff] }
  0x2c   :  { %v1081_v16 = vadd.f32 %v1080_v11, %v826_v10  ;;  %v838_v10 = vmul.f32 %v582_v63, %v582_v63  ;;  %v340_v63 = vld [vmem:[#allocation5 + $0x140] sm:$0xff] }
  0x2e   :  { %v1082_v21 = vadd.f32 %v1081_v16, %v827_v15  ;;  %v839_v15 = vmul.f32 %v583_v4, %v583_v4  ;;  %v341_v4 = vld [vmem:[#allocation5 + $0x148] sm:$0xff] }
  0x30   :  { %v1083_v26 = vadd.f32 %v1082_v21, %v828_v20  ;;  %v840_v20 = vmul.f32 %v584_v9, %v584_v9  ;;  %v342_v9 = vld [vmem:[#allocation5 + $0x150] sm:$0xff] }
  0x32   :  { %v1084_v31 = vadd.f32 %v1083_v26, %v829_v25  ;;  %v841_v25 = vmul.f32 %v585_v14, %v585_v14  ;;  %v343_v14 = vld [vmem:[#allocation5 + $0x158] sm:$0xff] }
  0x34   :  { %v1085_v36 = vadd.f32 %v1084_v31, %v830_v30  ;;  %v842_v30 = vmul.f32 %v586_v19, %v586_v19  ;;  %v344_v19 = vld [vmem:[#allocation5 + $0x160] sm:$0xff] }
  0x36   :  { %v1086_v43 = vadd.f32 %v1085_v36, %v831_v35  ;;  %v843_v35 = vmul.f32 %v587_v24, %v587_v24  ;;  %v345_v24 = vld [vmem:[#allocation5 + $0x168] sm:$0xff] }
  0x38   :  { %v1087_v51 = vadd.f32 %v1086_v43, %v832_v42  ;;  %v80_v42 = vld [vmem:[#allocation2 + $0x120] sm:$0xff] }
  0x39   :  { %v336_v43 = vld [vmem:[#allocation5 + $0x120] sm:$0xff] }
  0x3a   :  { %v1088_v60 = vadd.f32 %v1087_v51, %v833_v50  ;;  %v592_v49 = vsub.f32 %v80_v42, %v336_v43  ;;  %v846_v50 = vmul.f32 %v590_v39, %v590_v39  ;;  %v348_v39 = vld [vmem:[#allocation5 + $0x180] sm:$0xff]  ;;  %v93_v43 = vld [vmem:[#allocation2 + $0x188] sm:$0xff] }
  0x3c   :  { %v1089_v1 = vadd.f32 %v1088_v60, %v834_v55  ;;  %v847_v55 = vmul.f32 %v591_v44, %v591_v44  ;;  %v848_v60 = vmul.f32 %v592_v49, %v592_v49  ;;  %v349_v44 = vld [vmem:[#allocation5 + $0x188] sm:$0xff]  ;;  %v350_v49 = vld [vmem:[#allocation5 + $0x190] sm:$0xff] }
  0x3e   :  { %v1090_v6 = vadd.f32 %v1089_v1, %v835_v59  ;;  %v594_v59 = vsub.f32 %v82_v52, %v338_v53  ;;  %v849_v1 = vmul.f32 %v593_v54, %v593_v54  ;;  %v95_v53 = vld [vmem:[#allocation2 + $0x198] sm:$0xff] }
  0x3f   :  { %v351_v54 = vld [vmem:[#allocation5 + $0x198] sm:$0xff] }
  0x40   :  { %v1091_v11 = vadd.f32 %v1090_v6, %v836_v0  ;;  %v595_v0 = vsub.f32 %v83_v57, %v339_v58  ;;  %v850_v6 = vmul.f32 %v594_v59, %v594_v59  ;;  %v96_v58 = vld [vmem:[#allocation2 + $0x1a0] sm:$0xff] }
  0x41   :  { %v352_v59 = vld [vmem:[#allocation5 + $0x1a0] sm:$0xff] }
  0x42   :  { %v1092_v16 = vadd.f32 %v1091_v11, %v837_v5  ;;  %v596_v5 = vsub.f32 %v84_v62, %v340_v63  ;;  %v851_v11 = vmul.f32 %v595_v0, %v595_v0  ;;  %v97_v63 = vld [vmem:[#allocation2 + $0x1a8] sm:$0xff] }
  0x43   :  { %v353_v0 = vld [vmem:[#allocation5 + $0x1a8] sm:$0xff] }
  0x44   :  { %v1093_v21 = vadd.f32 %v1092_v16, %v838_v10  ;;  %v597_v10 = vsub.f32 %v85_v3, %v341_v4  ;;  %v852_v16 = vmul.f32 %v596_v5, %v596_v5  ;;  %v98_v4 = vld [vmem:[#allocation2 + $0x1b0] sm:$0xff] }
  0x45   :  { %v354_v5 = vld [vmem:[#allocation5 + $0x1b0] sm:$0xff] }
  0x46   :  { %v1094_v26 = vadd.f32 %v1093_v21, %v839_v15  ;;  %v598_v15 = vsub.f32 %v86_v8, %v342_v9  ;;  %v853_v21 = vmul.f32 %v597_v10, %v597_v10  ;;  %v99_v9 = vld [vmem:[#allocation2 + $0x1b8] sm:$0xff] }
  0x47   :  { %v355_v10 = vld [vmem:[#allocation5 + $0x1b8] sm:$0xff] }
  0x48   :  { %v1095_v31 = vadd.f32 %v1094_v26, %v840_v20  ;;  %v599_v20 = vsub.f32 %v87_v13, %v343_v14  ;;  %v854_v26 = vmul.f32 %v598_v15, %v598_v15  ;;  %v100_v14 = vld [vmem:[#allocation2 + $0x1c0] sm:$0xff] }
  0x49   :  { %v356_v15 = vld [vmem:[#allocation5 + $0x1c0] sm:$0xff] }
  0x4a   :  { %v1096_v36 = vadd.f32 %v1095_v31, %v841_v25  ;;  %v600_v25 = vsub.f32 %v88_v18, %v344_v19  ;;  %v855_v31 = vmul.f32 %v599_v20, %v599_v20  ;;  %v101_v19 = vld [vmem:[#allocation2 + $0x1c8] sm:$0xff] }
  0x4b   :  { %v357_v20 = vld [vmem:[#allocation5 + $0x1c8] sm:$0xff] }
  0x4c   :  { %v1097_v41 = vadd.f32 %v1096_v36, %v842_v30  ;;  %v601_v30 = vsub.f32 %v89_v23, %v345_v24  ;;  %v856_v36 = vmul.f32 %v600_v25, %v600_v25  ;;  %v102_v24 = vld [vmem:[#allocation2 + $0x1d0] sm:$0xff] }
  0x4d   :  { %v358_v25 = vld [vmem:[#allocation5 + $0x1d0] sm:$0xff] }
  0x4e   :  { %v1098_v46 = vadd.f32 %v1097_v41, %v843_v35  ;;  %v602_v35 = vsub.f32 %v90_v28, %v346_v29  ;;  %v857_v41 = vmul.f32 %v601_v30, %v601_v30  ;;  %v103_v29 = vld [vmem:[#allocation2 + $0x1d8] sm:$0xff] }
  0x4f   :  { %v359_v30 = vld [vmem:[#allocation5 + $0x1d8] sm:$0xff] }
  0x50   :  { %v1099_v51 = vadd.f32 %v1098_v46, %v844_v40  ;;  %v603_v40 = vsub.f32 %v91_v33, %v347_v34  ;;  %v858_v46 = vmul.f32 %v602_v35, %v602_v35  ;;  %v104_v34 = vld [vmem:[#allocation2 + $0x1e0] sm:$0xff] }
  0x51   :  { %v360_v35 = vld [vmem:[#allocation5 + $0x1e0] sm:$0xff] }
  0x52   :  { %v1100_v56 = vadd.f32 %v1099_v51, %v845_v45  ;;  %v604_v45 = vsub.f32 %v92_v38, %v348_v39  ;;  %v859_v51 = vmul.f32 %v603_v40, %v603_v40  ;;  %v105_v39 = vld [vmem:[#allocation2 + $0x1e8] sm:$0xff] }
  0x53   :  { %v361_v40 = vld [vmem:[#allocation5 + $0x1e8] sm:$0xff] }
  0x54   :  { %v1101_v61 = vadd.f32 %v1100_v56, %v846_v50  ;;  %v605_v50 = vsub.f32 %v93_v43, %v349_v44  ;;  %v860_v56 = vmul.f32 %v604_v45, %v604_v45  ;;  %v106_v44 = vld [vmem:[#allocation2 + $0x1f0] sm:$0xff] }
  0x55   :  { %v362_v45 = vld [vmem:[#allocation5 + $0x1f0] sm:$0xff] }
  0x56   :  { %v1102_v2 = vadd.f32 %v1101_v61, %v847_v55  ;;  %v606_v55 = vsub.f32 %v94_v48, %v350_v49  ;;  %v861_v61 = vmul.f32 %v605_v50, %v605_v50  ;;  %v107_v49 = vld [vmem:[#allocation2 + $0x1f8] sm:$0xff] }
  0x57   :  { %v363_v50 = vld [vmem:[#allocation5 + $0x1f8] sm:$0xff] }
  0x58   :  { %v1103_v7 = vadd.f32 %v1102_v2, %v848_v60  ;;  %v607_v60 = vsub.f32 %v95_v53, %v351_v54  ;;  %v862_v2 = vmul.f32 %v606_v55, %v606_v55  ;;  %v108_v54 = vld [vmem:[#allocation2 + $0x200] sm:$0xff] }
  0x59   :  { %v364_v55 = vld [vmem:[#allocation5 + $0x200] sm:$0xff] }
  0x5a   :  { %v1104_v12 = vadd.f32 %v1103_v7, %v849_v1  ;;  %v608_v1 = vsub.f32 %v96_v58, %v352_v59  ;;  %v863_v7 = vmul.f32 %v607_v60, %v607_v60  ;;  %v109_v59 = vld [vmem:[#allocation2 + $0x208] sm:$0xff] }
  0x5b   :  { %v365_v60 = vld [vmem:[#allocation5 + $0x208] sm:$0xff] }
  0x5c   :  { %v1105_v17 = vadd.f32 %v1104_v12, %v850_v6  ;;  %v609_v6 = vsub.f32 %v97_v63, %v353_v0  ;;  %v864_v12 = vmul.f32 %v608_v1, %v608_v1  ;;  %v110_v0 = vld [vmem:[#allocation2 + $0x210] sm:$0xff] }
  0x5d   :  { %v366_v1 = vld [vmem:[#allocation5 + $0x210] sm:$0xff] }
  0x5e   :  { %v1106_v22 = vadd.f32 %v1105_v17, %v851_v11  ;;  %v610_v11 = vsub.f32 %v98_v4, %v354_v5  ;;  %v865_v17 = vmul.f32 %v609_v6, %v609_v6  ;;  %v111_v5 = vld [vmem:[#allocation2 + $0x218] sm:$0xff] }
  0x5f   :  { %v367_v6 = vld [vmem:[#allocation5 + $0x218] sm:$0xff] }
  0x60   :  { %v1107_v27 = vadd.f32 %v1106_v22, %v852_v16  ;;  %v611_v16 = vsub.f32 %v99_v9, %v355_v10  ;;  %v866_v22 = vmul.f32 %v610_v11, %v610_v11  ;;  %v112_v10 = vld [vmem:[#allocation2 + $0x220] sm:$0xff] }
  0x61   :  { %v368_v11 = vld [vmem:[#allocation5 + $0x220] sm:$0xff] }
  0x62   :  { %v1108_v32 = vadd.f32 %v1107_v27, %v853_v21  ;;  %v612_v21 = vsub.f32 %v100_v14, %v356_v15  ;;  %v867_v27 = vmul.f32 %v611_v16, %v611_v16  ;;  %v113_v15 = vld [vmem:[#allocation2 + $0x228] sm:$0xff] }
  0x63   :  { %v369_v16 = vld [vmem:[#allocation5 + $0x228] sm:$0xff] }
  0x64   :  { %v1109_v37 = vadd.f32 %v1108_v32, %v854_v26  ;;  %v613_v26 = vsub.f32 %v101_v19, %v357_v20  ;;  %v868_v32 = vmul.f32 %v612_v21, %v612_v21  ;;  %v114_v20 = vld [vmem:[#allocation2 + $0x230] sm:$0xff] }
  0x65   :  { %v370_v21 = vld [vmem:[#allocation5 + $0x230] sm:$0xff] }
  0x66   :  { %v1110_v42 = vadd.f32 %v1109_v37, %v855_v31  ;;  %v614_v31 = vsub.f32 %v102_v24, %v358_v25  ;;  %v869_v37 = vmul.f32 %v613_v26, %v613_v26  ;;  %v115_v25 = vld [vmem:[#allocation2 + $0x238] sm:$0xff] }
  0x67   :  { %v371_v26 = vld [vmem:[#allocation5 + $0x238] sm:$0xff] }
  0x68   :  { %v1111_v47 = vadd.f32 %v1110_v42, %v856_v36  ;;  %v615_v36 = vsub.f32 %v103_v29, %v359_v30  ;;  %v870_v42 = vmul.f32 %v614_v31, %v614_v31  ;;  %v116_v30 = vld [vmem:[#allocation2 + $0x240] sm:$0xff] }
  0x69   :  { %v372_v31 = vld [vmem:[#allocation5 + $0x240] sm:$0xff] }
  0x6a   :  { %v1112_v52 = vadd.f32 %v1111_v47, %v857_v41  ;;  %v616_v41 = vsub.f32 %v104_v34, %v360_v35  ;;  %v871_v47 = vmul.f32 %v615_v36, %v615_v36  ;;  %v117_v35 = vld [vmem:[#allocation2 + $0x248] sm:$0xff] }
  0x6b   :  { %v373_v36 = vld [vmem:[#allocation5 + $0x248] sm:$0xff] }
  0x6c   :  { %v1113_v57 = vadd.f32 %v1112_v52, %v858_v46  ;;  %v617_v46 = vsub.f32 %v105_v39, %v361_v40  ;;  %v872_v52 = vmul.f32 %v616_v41, %v616_v41  ;;  %v118_v40 = vld [vmem:[#allocation2 + $0x250] sm:$0xff] }
  0x6d   :  { %v374_v41 = vld [vmem:[#allocation5 + $0x250] sm:$0xff] }
  0x6e   :  { %v1114_v62 = vadd.f32 %v1113_v57, %v859_v51  ;;  %v618_v51 = vsub.f32 %v106_v44, %v362_v45  ;;  %v873_v57 = vmul.f32 %v617_v46, %v617_v46  ;;  %v119_v45 = vld [vmem:[#allocation2 + $0x258] sm:$0xff] }
  0x6f   :  { %v375_v46 = vld [vmem:[#allocation5 + $0x258] sm:$0xff] }
  0x70   :  { %v1115_v3 = vadd.f32 %v1114_v62, %v860_v56  ;;  %v619_v56 = vsub.f32 %v107_v49, %v363_v50  ;;  %v874_v62 = vmul.f32 %v618_v51, %v618_v51  ;;  %v120_v50 = vld [vmem:[#allocation2 + $0x260] sm:$0xff] }
  0x71   :  { %v376_v51 = vld [vmem:[#allocation5 + $0x260] sm:$0xff] }
  0x72   :  { %v1116_v8 = vadd.f32 %v1115_v3, %v861_v61  ;;  %v620_v61 = vsub.f32 %v108_v54, %v364_v55  ;;  %v875_v3 = vmul.f32 %v619_v56, %v619_v56  ;;  %v121_v55 = vld [vmem:[#allocation2 + $0x268] sm:$0xff] }
  0x73   :  { %v377_v56 = vld [vmem:[#allocation5 + $0x268] sm:$0xff] }
  0x74   :  { %v1117_v13 = vadd.f32 %v1116_v8, %v862_v2  ;;  %v621_v2 = vsub.f32 %v109_v59, %v365_v60  ;;  %v876_v8 = vmul.f32 %v620_v61, %v620_v61  ;;  %v122_v60 = vld [vmem:[#allocation2 + $0x270] sm:$0xff] }
  0x75   :  { %v378_v61 = vld [vmem:[#allocation5 + $0x270] sm:$0xff] }
  0x76   :  { %v1118_v18 = vadd.f32 %v1117_v13, %v863_v7  ;;  %v622_v7 = vsub.f32 %v110_v0, %v366_v1  ;;  %v877_v13 = vmul.f32 %v621_v2, %v621_v2  ;;  %v123_v1 = vld [vmem:[#allocation2 + $0x278] sm:$0xff] }
  0x77   :  { %v379_v2 = vld [vmem:[#allocation5 + $0x278] sm:$0xff] }
  0x78   :  { %v1119_v23 = vadd.f32 %v1118_v18, %v864_v12  ;;  %v623_v12 = vsub.f32 %v111_v5, %v367_v6  ;;  %v878_v18 = vmul.f32 %v622_v7, %v622_v7  ;;  %v124_v6 = vld [vmem:[#allocation2 + $0x280] sm:$0xff] }
  0x79   :  { %v380_v7 = vld [vmem:[#allocation5 + $0x280] sm:$0xff] }
  0x7a   :  { %v1120_v28 = vadd.f32 %v1119_v23, %v865_v17  ;;  %v624_v17 = vsub.f32 %v112_v10, %v368_v11  ;;  %v879_v23 = vmul.f32 %v623_v12, %v623_v12  ;;  %v125_v11 = vld [vmem:[#allocation2 + $0x288] sm:$0xff] }
  0x7b   :  { %v381_v12 = vld [vmem:[#allocation5 + $0x288] sm:$0xff] }
  0x7c   :  { %v1121_v33 = vadd.f32 %v1120_v28, %v866_v22  ;;  %v625_v22 = vsub.f32 %v113_v15, %v369_v16  ;;  %v880_v28 = vmul.f32 %v624_v17, %v624_v17  ;;  %v126_v16 = vld [vmem:[#allocation2 + $0x290] sm:$0xff] }
  0x7d   :  { %v382_v17 = vld [vmem:[#allocation5 + $0x290] sm:$0xff] }
  0x7e   :  { %v1122_v38 = vadd.f32 %v1121_v33, %v867_v27  ;;  %v626_v27 = vsub.f32 %v114_v20, %v370_v21  ;;  %v881_v33 = vmul.f32 %v625_v22, %v625_v22  ;;  %v127_v21 = vld [vmem:[#allocation2 + $0x298] sm:$0xff] }
  0x7f   :  { %v383_v22 = vld [vmem:[#allocation5 + $0x298] sm:$0xff] }
  0x80   :  { %v1123_v43 = vadd.f32 %v1122_v38, %v868_v32  ;;  %v627_v32 = vsub.f32 %v115_v25, %v371_v26  ;;  %v882_v38 = vmul.f32 %v626_v27, %v626_v27  ;;  %v128_v26 = vld [vmem:[#allocation2 + $0x2a0] sm:$0xff] }
  0x81   :  { %v384_v27 = vld [vmem:[#allocation5 + $0x2a0] sm:$0xff] }
  0x82   :  { %v1124_v48 = vadd.f32 %v1123_v43, %v869_v37  ;;  %v628_v37 = vsub.f32 %v116_v30, %v372_v31  ;;  %v883_v43 = vmul.f32 %v627_v32, %v627_v32  ;;  %v129_v31 = vld [vmem:[#allocation2 + $0x2a8] sm:$0xff] }
  0x83   :  { %v385_v32 = vld [vmem:[#allocation5 + $0x2a8] sm:$0xff] }
  0x84   :  { %v1125_v53 = vadd.f32 %v1124_v48, %v870_v42  ;;  %v629_v42 = vsub.f32 %v117_v35, %v373_v36  ;;  %v884_v48 = vmul.f32 %v628_v37, %v628_v37  ;;  %v130_v36 = vld [vmem:[#allocation2 + $0x2b0] sm:$0xff] }
  0x85   :  { %v386_v37 = vld [vmem:[#allocation5 + $0x2b0] sm:$0xff] }
  0x86   :  { %v1126_v58 = vadd.f32 %v1125_v53, %v871_v47  ;;  %v630_v47 = vsub.f32 %v118_v40, %v374_v41  ;;  %v885_v53 = vmul.f32 %v629_v42, %v629_v42  ;;  %v131_v41 = vld [vmem:[#allocation2 + $0x2b8] sm:$0xff] }
  0x87   :  { %v387_v42 = vld [vmem:[#allocation5 + $0x2b8] sm:$0xff] }
  0x88   :  { %v1127_v63 = vadd.f32 %v1126_v58, %v872_v52  ;;  %v631_v52 = vsub.f32 %v119_v45, %v375_v46  ;;  %v886_v58 = vmul.f32 %v630_v47, %v630_v47  ;;  %v132_v46 = vld [vmem:[#allocation2 + $0x2c0] sm:$0xff] }
  0x89   :  { %v388_v47 = vld [vmem:[#allocation5 + $0x2c0] sm:$0xff] }
  0x8a   :  { %v1128_v4 = vadd.f32 %v1127_v63, %v873_v57  ;;  %v632_v57 = vsub.f32 %v120_v50, %v376_v51  ;;  %v887_v63 = vmul.f32 %v631_v52, %v631_v52  ;;  %v133_v51 = vld [vmem:[#allocation2 + $0x2c8] sm:$0xff] }
  0x8b   :  { %v389_v52 = vld [vmem:[#allocation5 + $0x2c8] sm:$0xff] }
  0x8c   :  { %v1129_v9 = vadd.f32 %v1128_v4, %v874_v62  ;;  %v633_v62 = vsub.f32 %v121_v55, %v377_v56  ;;  %v888_v4 = vmul.f32 %v632_v57, %v632_v57  ;;  %v134_v56 = vld [vmem:[#allocation2 + $0x2d0] sm:$0xff] }
  0x8d   :  { %v390_v57 = vld [vmem:[#allocation5 + $0x2d0] sm:$0xff] }
  0x8e   :  { %v1130_v14 = vadd.f32 %v1129_v9, %v875_v3  ;;  %v634_v3 = vsub.f32 %v122_v60, %v378_v61  ;;  %v889_v9 = vmul.f32 %v633_v62, %v633_v62  ;;  %v135_v61 = vld [vmem:[#allocation2 + $0x2d8] sm:$0xff] }
  0x8f   :  { %v391_v62 = vld [vmem:[#allocation5 + $0x2d8] sm:$0xff] }
  0x90   :  { %v1131_v19 = vadd.f32 %v1130_v14, %v876_v8  ;;  %v635_v8 = vsub.f32 %v123_v1, %v379_v2  ;;  %v890_v14 = vmul.f32 %v634_v3, %v634_v3  ;;  %v136_v2 = vld [vmem:[#allocation2 + $0x2e0] sm:$0xff] }
  0x91   :  { %v392_v3 = vld [vmem:[#allocation5 + $0x2e0] sm:$0xff] }
  0x92   :  { %v1132_v24 = vadd.f32 %v1131_v19, %v877_v13  ;;  %v636_v13 = vsub.f32 %v124_v6, %v380_v7  ;;  %v891_v19 = vmul.f32 %v635_v8, %v635_v8  ;;  %v137_v7 = vld [vmem:[#allocation2 + $0x2e8] sm:$0xff] }
  0x93   :  { %v393_v8 = vld [vmem:[#allocation5 + $0x2e8] sm:$0xff] }
  0x94   :  { %v1133_v29 = vadd.f32 %v1132_v24, %v878_v18  ;;  %v637_v18 = vsub.f32 %v125_v11, %v381_v12  ;;  %v892_v24 = vmul.f32 %v636_v13, %v636_v13  ;;  %v138_v12 = vld [vmem:[#allocation2 + $0x2f0] sm:$0xff] }
  0x95   :  { %v394_v13 = vld [vmem:[#allocation5 + $0x2f0] sm:$0xff] }
  0x96   :  { %v1134_v34 = vadd.f32 %v1133_v29, %v879_v23  ;;  %v638_v23 = vsub.f32 %v126_v16, %v382_v17  ;;  %v893_v29 = vmul.f32 %v637_v18, %v637_v18  ;;  %v139_v17 = vld [vmem:[#allocation2 + $0x2f8] sm:$0xff] }
  0x97   :  { %v395_v18 = vld [vmem:[#allocation5 + $0x2f8] sm:$0xff] }
  0x98   :  { %v1135_v39 = vadd.f32 %v1134_v34, %v880_v28  ;;  %v639_v28 = vsub.f32 %v127_v21, %v383_v22  ;;  %v894_v34 = vmul.f32 %v638_v23, %v638_v23  ;;  %v140_v22 = vld [vmem:[#allocation2 + $0x300] sm:$0xff] }
  0x99   :  { %v396_v23 = vld [vmem:[#allocation5 + $0x300] sm:$0xff] }
  0x9a   :  { %v1136_v44 = vadd.f32 %v1135_v39, %v881_v33  ;;  %v640_v33 = vsub.f32 %v128_v26, %v384_v27  ;;  %v895_v39 = vmul.f32 %v639_v28, %v639_v28  ;;  %v141_v27 = vld [vmem:[#allocation2 + $0x308] sm:$0xff] }
  0x9b   :  { %v397_v28 = vld [vmem:[#allocation5 + $0x308] sm:$0xff] }
  0x9c   :  { %v1137_v49 = vadd.f32 %v1136_v44, %v882_v38  ;;  %v641_v38 = vsub.f32 %v129_v31, %v385_v32  ;;  %v896_v44 = vmul.f32 %v640_v33, %v640_v33  ;;  %v142_v32 = vld [vmem:[#allocation2 + $0x310] sm:$0xff] }
  0x9d   :  { %v398_v33 = vld [vmem:[#allocation5 + $0x310] sm:$0xff] }
  0x9e   :  { %v1138_v54 = vadd.f32 %v1137_v49, %v883_v43  ;;  %v642_v43 = vsub.f32 %v130_v36, %v386_v37  ;;  %v897_v49 = vmul.f32 %v641_v38, %v641_v38  ;;  %v143_v37 = vld [vmem:[#allocation2 + $0x318] sm:$0xff] }
  0x9f   :  { %v399_v38 = vld [vmem:[#allocation5 + $0x318] sm:$0xff] }
  0xa0   :  { %v1139_v59 = vadd.f32 %v1138_v54, %v884_v48  ;;  %v643_v48 = vsub.f32 %v131_v41, %v387_v42  ;;  %v898_v54 = vmul.f32 %v642_v43, %v642_v43  ;;  %v144_v42 = vld [vmem:[#allocation2 + $0x320] sm:$0xff] }
  0xa1   :  { %v400_v43 = vld [vmem:[#allocation5 + $0x320] sm:$0xff] }
  0xa2   :  { %v1140_v0 = vadd.f32 %v1139_v59, %v885_v53  ;;  %v644_v53 = vsub.f32 %v132_v46, %v388_v47  ;;  %v899_v59 = vmul.f32 %v643_v48, %v643_v48  ;;  %v145_v47 = vld [vmem:[#allocation2 + $0x328] sm:$0xff] }
  0xa3   :  { %v401_v48 = vld [vmem:[#allocation5 + $0x328] sm:$0xff] }
  0xa4   :  { %v1141_v5 = vadd.f32 %v1140_v0, %v886_v58  ;;  %v645_v58 = vsub.f32 %v133_v51, %v389_v52  ;;  %v900_v0 = vmul.f32 %v644_v53, %v644_v53  ;;  %v146_v52 = vld [vmem:[#allocation2 + $0x330] sm:$0xff] }
  0xa5   :  { %v402_v53 = vld [vmem:[#allocation5 + $0x330] sm:$0xff] }
  0xa6   :  { %v1142_v10 = vadd.f32 %v1141_v5, %v887_v63  ;;  %v646_v63 = vsub.f32 %v134_v56, %v390_v57  ;;  %v901_v5 = vmul.f32 %v645_v58, %v645_v58  ;;  %v147_v57 = vld [vmem:[#allocation2 + $0x338] sm:$0xff] }
  0xa7   :  { %v403_v58 = vld [vmem:[#allocation5 + $0x338] sm:$0xff] }
  0xa8   :  { %v1143_v15 = vadd.f32 %v1142_v10, %v888_v4  ;;  %v647_v4 = vsub.f32 %v135_v61, %v391_v62  ;;  %v902_v10 = vmul.f32 %v646_v63, %v646_v63  ;;  %v148_v62 = vld [vmem:[#allocation2 + $0x340] sm:$0xff] }
  0xa9   :  { %v404_v63 = vld [vmem:[#allocation5 + $0x340] sm:$0xff] }
  0xaa   :  { %v1144_v20 = vadd.f32 %v1143_v15, %v889_v9  ;;  %v648_v9 = vsub.f32 %v136_v2, %v392_v3  ;;  %v903_v15 = vmul.f32 %v647_v4, %v647_v4  ;;  %v149_v3 = vld [vmem:[#allocation2 + $0x348] sm:$0xff] }
  0xab   :  { %v405_v4 = vld [vmem:[#allocation5 + $0x348] sm:$0xff] }
  0xac   :  { %v1145_v25 = vadd.f32 %v1144_v20, %v890_v14  ;;  %v649_v14 = vsub.f32 %v137_v7, %v393_v8  ;;  %v904_v20 = vmul.f32 %v648_v9, %v648_v9  ;;  %v150_v8 = vld [vmem:[#allocation2 + $0x350] sm:$0xff] }
  0xad   :  { %v406_v9 = vld [vmem:[#allocation5 + $0x350] sm:$0xff] }
  0xae   :  { %v1146_v30 = vadd.f32 %v1145_v25, %v891_v19  ;;  %v650_v19 = vsub.f32 %v138_v12, %v394_v13  ;;  %v905_v25 = vmul.f32 %v649_v14, %v649_v14  ;;  %v151_v13 = vld [vmem:[#allocation2 + $0x358] sm:$0xff] }
  0xaf   :  { %v407_v14 = vld [vmem:[#allocation5 + $0x358] sm:$0xff] }
  0xb0   :  { %v1147_v35 = vadd.f32 %v1146_v30, %v892_v24  ;;  %v651_v24 = vsub.f32 %v139_v17, %v395_v18  ;;  %v906_v30 = vmul.f32 %v650_v19, %v650_v19  ;;  %v152_v18 = vld [vmem:[#allocation2 + $0x360] sm:$0xff] }
  0xb1   :  { %v408_v19 = vld [vmem:[#allocation5 + $0x360] sm:$0xff] }
  0xb2   :  { %v1148_v40 = vadd.f32 %v1147_v35, %v893_v29  ;;  %v652_v29 = vsub.f32 %v140_v22, %v396_v23  ;;  %v907_v35 = vmul.f32 %v651_v24, %v651_v24  ;;  %v153_v23 = vld [vmem:[#allocation2 + $0x368] sm:$0xff] }
  0xb3   :  { %v409_v24 = vld [vmem:[#allocation5 + $0x368] sm:$0xff] }
  0xb4   :  { %v1149_v45 = vadd.f32 %v1148_v40, %v894_v34  ;;  %v653_v34 = vsub.f32 %v141_v27, %v397_v28  ;;  %v908_v40 = vmul.f32 %v652_v29, %v652_v29  ;;  %v154_v28 = vld [vmem:[#allocation2 + $0x370] sm:$0xff] }
  0xb5   :  { %v410_v29 = vld [vmem:[#allocation5 + $0x370] sm:$0xff] }
  0xb6   :  { %v1150_v50 = vadd.f32 %v1149_v45, %v895_v39  ;;  %v654_v39 = vsub.f32 %v142_v32, %v398_v33  ;;  %v909_v45 = vmul.f32 %v653_v34, %v653_v34  ;;  %v155_v33 = vld [vmem:[#allocation2 + $0x378] sm:$0xff] }
  0xb7   :  { %v411_v34 = vld [vmem:[#allocation5 + $0x378] sm:$0xff] }
  0xb8   :  { %v1151_v55 = vadd.f32 %v1150_v50, %v896_v44  ;;  %v655_v44 = vsub.f32 %v143_v37, %v399_v38  ;;  %v910_v50 = vmul.f32 %v654_v39, %v654_v39  ;;  %v156_v38 = vld [vmem:[#allocation2 + $0x380] sm:$0xff] }
  0xb9   :  { %v412_v39 = vld [vmem:[#allocation5 + $0x380] sm:$0xff] }
  0xba   :  { %v1152_v60 = vadd.f32 %v1151_v55, %v897_v49  ;;  %v656_v49 = vsub.f32 %v144_v42, %v400_v43  ;;  %v911_v55 = vmul.f32 %v655_v44, %v655_v44  ;;  %v157_v43 = vld [vmem:[#allocation2 + $0x388] sm:$0xff] }
  0xbb   :  { %v413_v44 = vld [vmem:[#allocation5 + $0x388] sm:$0xff] }
  0xbc   :  { %v1153_v1 = vadd.f32 %v1152_v60, %v898_v54  ;;  %v657_v54 = vsub.f32 %v145_v47, %v401_v48  ;;  %v912_v60 = vmul.f32 %v656_v49, %v656_v49  ;;  %v158_v48 = vld [vmem:[#allocation2 + $0x390] sm:$0xff] }
  0xbd   :  { %v414_v49 = vld [vmem:[#allocation5 + $0x390] sm:$0xff] }
  0xbe   :  { %v1154_v6 = vadd.f32 %v1153_v1, %v899_v59  ;;  %v658_v59 = vsub.f32 %v146_v52, %v402_v53  ;;  %v913_v1 = vmul.f32 %v657_v54, %v657_v54  ;;  %v159_v53 = vld [vmem:[#allocation2 + $0x398] sm:$0xff] }
  0xbf   :  { %v415_v54 = vld [vmem:[#allocation5 + $0x398] sm:$0xff] }
  0xc0   :  { %v1155_v11 = vadd.f32 %v1154_v6, %v900_v0  ;;  %v659_v0 = vsub.f32 %v147_v57, %v403_v58  ;;  %v914_v6 = vmul.f32 %v658_v59, %v658_v59  ;;  %v160_v58 = vld [vmem:[#allocation2 + $0x3a0] sm:$0xff] }
  0xc1   :  { %v416_v59 = vld [vmem:[#allocation5 + $0x3a0] sm:$0xff] }
  0xc2   :  { %v1156_v16 = vadd.f32 %v1155_v11, %v901_v5  ;;  %v660_v5 = vsub.f32 %v148_v62, %v404_v63  ;;  %v915_v11 = vmul.f32 %v659_v0, %v659_v0  ;;  %v161_v63 = vld [vmem:[#allocation2 + $0x3a8] sm:$0xff] }
  0xc3   :  { %v417_v0 = vld [vmem:[#allocation5 + $0x3a8] sm:$0xff] }
  0xc4   :  { %v1157_v21 = vadd.f32 %v1156_v16, %v902_v10  ;;  %v661_v10 = vsub.f32 %v149_v3, %v405_v4  ;;  %v916_v16 = vmul.f32 %v660_v5, %v660_v5  ;;  %v162_v4 = vld [vmem:[#allocation2 + $0x3b0] sm:$0xff] }
  0xc5   :  { %v418_v5 = vld [vmem:[#allocation5 + $0x3b0] sm:$0xff] }
  0xc6   :  { %v1158_v26 = vadd.f32 %v1157_v21, %v903_v15  ;;  %v662_v15 = vsub.f32 %v150_v8, %v406_v9  ;;  %v917_v21 = vmul.f32 %v661_v10, %v661_v10  ;;  %v163_v9 = vld [vmem:[#allocation2 + $0x3b8] sm:$0xff] }
  0xc7   :  { %v419_v10 = vld [vmem:[#allocation5 + $0x3b8] sm:$0xff] }
  0xc8   :  { %v1159_v31 = vadd.f32 %v1158_v26, %v904_v20  ;;  %v663_v20 = vsub.f32 %v151_v13, %v407_v14  ;;  %v918_v26 = vmul.f32 %v662_v15, %v662_v15  ;;  %v164_v14 = vld [vmem:[#allocation2 + $0x3c0] sm:$0xff] }
  0xc9   :  { %v420_v15 = vld [vmem:[#allocation5 + $0x3c0] sm:$0xff] }
  0xca   :  { %v1160_v36 = vadd.f32 %v1159_v31, %v905_v25  ;;  %v664_v25 = vsub.f32 %v152_v18, %v408_v19  ;;  %v919_v31 = vmul.f32 %v663_v20, %v663_v20  ;;  %v165_v19 = vld [vmem:[#allocation2 + $0x3c8] sm:$0xff] }
  0xcb   :  { %v421_v20 = vld [vmem:[#allocation5 + $0x3c8] sm:$0xff] }
  0xcc   :  { %v1161_v41 = vadd.f32 %v1160_v36, %v906_v30  ;;  %v665_v30 = vsub.f32 %v153_v23, %v409_v24  ;;  %v920_v36 = vmul.f32 %v664_v25, %v664_v25  ;;  %v166_v24 = vld [vmem:[#allocation2 + $0x3d0] sm:$0xff] }
  0xcd   :  { %v422_v25 = vld [vmem:[#allocation5 + $0x3d0] sm:$0xff] }
  0xce   :  { %v1162_v46 = vadd.f32 %v1161_v41, %v907_v35  ;;  %v666_v35 = vsub.f32 %v154_v28, %v410_v29  ;;  %v921_v41 = vmul.f32 %v665_v30, %v665_v30  ;;  %v167_v29 = vld [vmem:[#allocation2 + $0x3d8] sm:$0xff] }
  0xcf   :  { %v423_v30 = vld [vmem:[#allocation5 + $0x3d8] sm:$0xff] }
  0xd0   :  { %v1163_v51 = vadd.f32 %v1162_v46, %v908_v40  ;;  %v667_v40 = vsub.f32 %v155_v33, %v411_v34  ;;  %v922_v46 = vmul.f32 %v666_v35, %v666_v35  ;;  %v168_v34 = vld [vmem:[#allocation2 + $0x3e0] sm:$0xff] }
  0xd1   :  { %v424_v35 = vld [vmem:[#allocation5 + $0x3e0] sm:$0xff] }
  0xd2   :  { %v1164_v56 = vadd.f32 %v1163_v51, %v909_v45  ;;  %v668_v45 = vsub.f32 %v156_v38, %v412_v39  ;;  %v923_v51 = vmul.f32 %v667_v40, %v667_v40  ;;  %v169_v39 = vld [vmem:[#allocation2 + $0x3e8] sm:$0xff] }
  0xd3   :  { %v425_v40 = vld [vmem:[#allocation5 + $0x3e8] sm:$0xff] }
  0xd4   :  { %v1165_v61 = vadd.f32 %v1164_v56, %v910_v50  ;;  %v669_v50 = vsub.f32 %v157_v43, %v413_v44  ;;  %v924_v56 = vmul.f32 %v668_v45, %v668_v45  ;;  %v170_v44 = vld [vmem:[#allocation2 + $0x3f0] sm:$0xff] }
  0xd5   :  { %v426_v45 = vld [vmem:[#allocation5 + $0x3f0] sm:$0xff] }
  0xd6   :  { %v1166_v2 = vadd.f32 %v1165_v61, %v911_v55  ;;  %v670_v55 = vsub.f32 %v158_v48, %v414_v49  ;;  %v925_v61 = vmul.f32 %v669_v50, %v669_v50  ;;  %v171_v49 = vld [vmem:[#allocation2 + $0x3f8] sm:$0xff] }
  0xd7   :  { %v427_v50 = vld [vmem:[#allocation5 + $0x3f8] sm:$0xff] }
  0xd8   :  { %v1167_v7 = vadd.f32 %v1166_v2, %v912_v60  ;;  %v671_v60 = vsub.f32 %v159_v53, %v415_v54  ;;  %v926_v2 = vmul.f32 %v670_v55, %v670_v55  ;;  %v172_v54 = vld [vmem:[#allocation2 + $0x400] sm:$0xff] }
  0xd9   :  { %v428_v55 = vld [vmem:[#allocation5 + $0x400] sm:$0xff] }
  0xda   :  { %v1168_v12 = vadd.f32 %v1167_v7, %v913_v1  ;;  %v672_v1 = vsub.f32 %v160_v58, %v416_v59  ;;  %v927_v7 = vmul.f32 %v671_v60, %v671_v60  ;;  %v173_v59 = vld [vmem:[#allocation2 + $0x408] sm:$0xff] }
  0xdb   :  { %v429_v60 = vld [vmem:[#allocation5 + $0x408] sm:$0xff] }
  0xdc   :  { %v1169_v17 = vadd.f32 %v1168_v12, %v914_v6  ;;  %v673_v6 = vsub.f32 %v161_v63, %v417_v0  ;;  %v928_v12 = vmul.f32 %v672_v1, %v672_v1  ;;  %v174_v0 = vld [vmem:[#allocation2 + $0x410] sm:$0xff] }
  0xdd   :  { %v430_v1 = vld [vmem:[#allocation5 + $0x410] sm:$0xff] }
  0xde   :  { %v1170_v22 = vadd.f32 %v1169_v17, %v915_v11  ;;  %v674_v11 = vsub.f32 %v162_v4, %v418_v5  ;;  %v929_v17 = vmul.f32 %v673_v6, %v673_v6  ;;  %v175_v5 = vld [vmem:[#allocation2 + $0x418] sm:$0xff] }
  0xdf   :  { %v431_v6 = vld [vmem:[#allocation5 + $0x418] sm:$0xff] }
  0xe0   :  { %v1171_v27 = vadd.f32 %v1170_v22, %v916_v16  ;;  %v675_v16 = vsub.f32 %v163_v9, %v419_v10  ;;  %v930_v22 = vmul.f32 %v674_v11, %v674_v11  ;;  %v176_v10 = vld [vmem:[#allocation2 + $0x420] sm:$0xff] }
  0xe1   :  { %v432_v11 = vld [vmem:[#allocation5 + $0x420] sm:$0xff] }
  0xe2   :  { %v1172_v32 = vadd.f32 %v1171_v27, %v917_v21  ;;  %v676_v21 = vsub.f32 %v164_v14, %v420_v15  ;;  %v931_v27 = vmul.f32 %v675_v16, %v675_v16  ;;  %v177_v15 = vld [vmem:[#allocation2 + $0x428] sm:$0xff] }
  0xe3   :  { %v433_v16 = vld [vmem:[#allocation5 + $0x428] sm:$0xff] }
  0xe4   :  { %v1173_v37 = vadd.f32 %v1172_v32, %v918_v26  ;;  %v677_v26 = vsub.f32 %v165_v19, %v421_v20  ;;  %v932_v32 = vmul.f32 %v676_v21, %v676_v21  ;;  %v178_v20 = vld [vmem:[#allocation2 + $0x430] sm:$0xff] }
  0xe5   :  { %v434_v21 = vld [vmem:[#allocation5 + $0x430] sm:$0xff] }
  0xe6   :  { %v1174_v42 = vadd.f32 %v1173_v37, %v919_v31  ;;  %v678_v31 = vsub.f32 %v166_v24, %v422_v25  ;;  %v933_v37 = vmul.f32 %v677_v26, %v677_v26  ;;  %v179_v25 = vld [vmem:[#allocation2 + $0x438] sm:$0xff] }
  0xe7   :  { %v435_v26 = vld [vmem:[#allocation5 + $0x438] sm:$0xff] }
  0xe8   :  { %v1175_v47 = vadd.f32 %v1174_v42, %v920_v36  ;;  %v679_v36 = vsub.f32 %v167_v29, %v423_v30  ;;  %v934_v42 = vmul.f32 %v678_v31, %v678_v31  ;;  %v180_v30 = vld [vmem:[#allocation2 + $0x440] sm:$0xff] }
  0xe9   :  { %v436_v31 = vld [vmem:[#allocation5 + $0x440] sm:$0xff] }
  0xea   :  { %v1176_v52 = vadd.f32 %v1175_v47, %v921_v41  ;;  %v680_v41 = vsub.f32 %v168_v34, %v424_v35  ;;  %v935_v47 = vmul.f32 %v679_v36, %v679_v36  ;;  %v181_v35 = vld [vmem:[#allocation2 + $0x448] sm:$0xff] }
  0xeb   :  { %v437_v36 = vld [vmem:[#allocation5 + $0x448] sm:$0xff] }
  0xec   :  { %v1177_v57 = vadd.f32 %v1176_v52, %v922_v46  ;;  %v681_v46 = vsub.f32 %v169_v39, %v425_v40  ;;  %v936_v52 = vmul.f32 %v680_v41, %v680_v41  ;;  %v182_v40 = vld [vmem:[#allocation2 + $0x450] sm:$0xff] }
  0xed   :  { %v438_v41 = vld [vmem:[#allocation5 + $0x450] sm:$0xff] }
  0xee   :  { %v1178_v62 = vadd.f32 %v1177_v57, %v923_v51  ;;  %v682_v51 = vsub.f32 %v170_v44, %v426_v45  ;;  %v937_v57 = vmul.f32 %v681_v46, %v681_v46  ;;  %v183_v45 = vld [vmem:[#allocation2 + $0x458] sm:$0xff] }
  0xef   :  { %v439_v46 = vld [vmem:[#allocation5 + $0x458] sm:$0xff] }
  0xf0   :  { %v1179_v3 = vadd.f32 %v1178_v62, %v924_v56  ;;  %v683_v56 = vsub.f32 %v171_v49, %v427_v50  ;;  %v938_v62 = vmul.f32 %v682_v51, %v682_v51  ;;  %v184_v50 = vld [vmem:[#allocation2 + $0x460] sm:$0xff] }
  0xf1   :  { %v440_v51 = vld [vmem:[#allocation5 + $0x460] sm:$0xff] }
  0xf2   :  { %v1180_v8 = vadd.f32 %v1179_v3, %v925_v61  ;;  %v684_v61 = vsub.f32 %v172_v54, %v428_v55  ;;  %v939_v3 = vmul.f32 %v683_v56, %v683_v56  ;;  %v185_v55 = vld [vmem:[#allocation2 + $0x468] sm:$0xff] }
  0xf3   :  { %v441_v56 = vld [vmem:[#allocation5 + $0x468] sm:$0xff] }
  0xf4   :  { %v1181_v13 = vadd.f32 %v1180_v8, %v926_v2  ;;  %v685_v2 = vsub.f32 %v173_v59, %v429_v60  ;;  %v940_v8 = vmul.f32 %v684_v61, %v684_v61  ;;  %v186_v60 = vld [vmem:[#allocation2 + $0x470] sm:$0xff] }
  0xf5   :  { %v442_v61 = vld [vmem:[#allocation5 + $0x470] sm:$0xff] }
  0xf6   :  { %v1182_v18 = vadd.f32 %v1181_v13, %v927_v7  ;;  %v686_v7 = vsub.f32 %v174_v0, %v430_v1  ;;  %v941_v13 = vmul.f32 %v685_v2, %v685_v2  ;;  %v187_v1 = vld [vmem:[#allocation2 + $0x478] sm:$0xff] }
  0xf7   :  { %v443_v2 = vld [vmem:[#allocation5 + $0x478] sm:$0xff] }
  0xf8   :  { %v1183_v23 = vadd.f32 %v1182_v18, %v928_v12  ;;  %v687_v12 = vsub.f32 %v175_v5, %v431_v6  ;;  %v942_v18 = vmul.f32 %v686_v7, %v686_v7  ;;  %v188_v6 = vld [vmem:[#allocation2 + $0x480] sm:$0xff] }
  0xf9   :  { %v444_v7 = vld [vmem:[#allocation5 + $0x480] sm:$0xff] }
  0xfa   :  { %v1184_v28 = vadd.f32 %v1183_v23, %v929_v17  ;;  %v688_v17 = vsub.f32 %v176_v10, %v432_v11  ;;  %v943_v23 = vmul.f32 %v687_v12, %v687_v12  ;;  %v189_v11 = vld [vmem:[#allocation2 + $0x488] sm:$0xff] }
  0xfb   :  { %v445_v12 = vld [vmem:[#allocation5 + $0x488] sm:$0xff] }
  0xfc   :  { %v1185_v33 = vadd.f32 %v1184_v28, %v930_v22  ;;  %v689_v22 = vsub.f32 %v177_v15, %v433_v16  ;;  %v944_v28 = vmul.f32 %v688_v17, %v688_v17  ;;  %v190_v16 = vld [vmem:[#allocation2 + $0x490] sm:$0xff] }
  0xfd   :  { %v446_v17 = vld [vmem:[#allocation5 + $0x490] sm:$0xff] }
  0xfe   :  { %v1186_v38 = vadd.f32 %v1185_v33, %v931_v27  ;;  %v690_v27 = vsub.f32 %v178_v20, %v434_v21  ;;  %v945_v33 = vmul.f32 %v689_v22, %v689_v22  ;;  %v191_v21 = vld [vmem:[#allocation2 + $0x498] sm:$0xff] }
  0xff   :  { %v447_v22 = vld [vmem:[#allocation5 + $0x498] sm:$0xff] }
 0x100   :  { %v1187_v43 = vadd.f32 %v1186_v38, %v932_v32  ;;  %v691_v32 = vsub.f32 %v179_v25, %v435_v26  ;;  %v946_v38 = vmul.f32 %v690_v27, %v690_v27  ;;  %v192_v26 = vld [vmem:[#allocation2 + $0x4a0] sm:$0xff] }
 0x101   :  { %v448_v27 = vld [vmem:[#allocation5 + $0x4a0] sm:$0xff] }
 0x102   :  { %v1188_v48 = vadd.f32 %v1187_v43, %v933_v37  ;;  %v692_v37 = vsub.f32 %v180_v30, %v436_v31  ;;  %v947_v43 = vmul.f32 %v691_v32, %v691_v32  ;;  %v193_v31 = vld [vmem:[#allocation2 + $0x4a8] sm:$0xff] }
 0x103   :  { %v449_v32 = vld [vmem:[#allocation5 + $0x4a8] sm:$0xff] }
 0x104   :  { %v1189_v53 = vadd.f32 %v1188_v48, %v934_v42  ;;  %v693_v42 = vsub.f32 %v181_v35, %v437_v36  ;;  %v948_v48 = vmul.f32 %v692_v37, %v692_v37  ;;  %v194_v36 = vld [vmem:[#allocation2 + $0x4b0] sm:$0xff] }
 0x105   :  { %v450_v37 = vld [vmem:[#allocation5 + $0x4b0] sm:$0xff] }
 0x106   :  { %v1190_v58 = vadd.f32 %v1189_v53, %v935_v47  ;;  %v694_v47 = vsub.f32 %v182_v40, %v438_v41  ;;  %v949_v53 = vmul.f32 %v693_v42, %v693_v42  ;;  %v195_v41 = vld [vmem:[#allocation2 + $0x4b8] sm:$0xff] }
 0x107   :  { %v451_v42 = vld [vmem:[#allocation5 + $0x4b8] sm:$0xff] }
 0x108   :  { %v1191_v63 = vadd.f32 %v1190_v58, %v936_v52  ;;  %v695_v52 = vsub.f32 %v183_v45, %v439_v46  ;;  %v950_v58 = vmul.f32 %v694_v47, %v694_v47  ;;  %v196_v46 = vld [vmem:[#allocation2 + $0x4c0] sm:$0xff] }
 0x109   :  { %v452_v47 = vld [vmem:[#allocation5 + $0x4c0] sm:$0xff] }
 0x10a   :  { %v1192_v4 = vadd.f32 %v1191_v63, %v937_v57  ;;  %v696_v57 = vsub.f32 %v184_v50, %v440_v51  ;;  %v951_v63 = vmul.f32 %v695_v52, %v695_v52  ;;  %v197_v51 = vld [vmem:[#allocation2 + $0x4c8] sm:$0xff] }
 0x10b   :  { %v453_v52 = vld [vmem:[#allocation5 + $0x4c8] sm:$0xff] }
 0x10c   :  { %v1193_v9 = vadd.f32 %v1192_v4, %v938_v62  ;;  %v697_v62 = vsub.f32 %v185_v55, %v441_v56  ;;  %v952_v4 = vmul.f32 %v696_v57, %v696_v57  ;;  %v198_v56 = vld [vmem:[#allocation2 + $0x4d0] sm:$0xff] }
 0x10d   :  { %v454_v57 = vld [vmem:[#allocation5 + $0x4d0] sm:$0xff] }
 0x10e   :  { %v1194_v14 = vadd.f32 %v1193_v9, %v939_v3  ;;  %v698_v3 = vsub.f32 %v186_v60, %v442_v61  ;;  %v953_v9 = vmul.f32 %v697_v62, %v697_v62  ;;  %v199_v61 = vld [vmem:[#allocation2 + $0x4d8] sm:$0xff] }
 0x10f   :  { %v455_v62 = vld [vmem:[#allocation5 + $0x4d8] sm:$0xff] }
 0x110   :  { %v1195_v19 = vadd.f32 %v1194_v14, %v940_v8  ;;  %v699_v8 = vsub.f32 %v187_v1, %v443_v2  ;;  %v954_v14 = vmul.f32 %v698_v3, %v698_v3  ;;  %v200_v2 = vld [vmem:[#allocation2 + $0x4e0] sm:$0xff] }
 0x111   :  { %v456_v3 = vld [vmem:[#allocation5 + $0x4e0] sm:$0xff] }
 0x112   :  { %v1196_v24 = vadd.f32 %v1195_v19, %v941_v13  ;;  %v700_v13 = vsub.f32 %v188_v6, %v444_v7  ;;  %v955_v19 = vmul.f32 %v699_v8, %v699_v8  ;;  %v201_v7 = vld [vmem:[#allocation2 + $0x4e8] sm:$0xff] }
 0x113   :  { %v457_v8 = vld [vmem:[#allocation5 + $0x4e8] sm:$0xff] }
 0x114   :  { %v1197_v29 = vadd.f32 %v1196_v24, %v942_v18  ;;  %v701_v18 = vsub.f32 %v189_v11, %v445_v12  ;;  %v956_v24 = vmul.f32 %v700_v13, %v700_v13  ;;  %v202_v12 = vld [vmem:[#allocation2 + $0x4f0] sm:$0xff] }
 0x115   :  { %v458_v13 = vld [vmem:[#allocation5 + $0x4f0] sm:$0xff] }
 0x116   :  { %v1198_v34 = vadd.f32 %v1197_v29, %v943_v23  ;;  %v702_v23 = vsub.f32 %v190_v16, %v446_v17  ;;  %v957_v29 = vmul.f32 %v701_v18, %v701_v18  ;;  %v203_v17 = vld [vmem:[#allocation2 + $0x4f8] sm:$0xff] }
 0x117   :  { %v459_v18 = vld [vmem:[#allocation5 + $0x4f8] sm:$0xff] }
 0x118   :  { %v1199_v39 = vadd.f32 %v1198_v34, %v944_v28  ;;  %v703_v28 = vsub.f32 %v191_v21, %v447_v22  ;;  %v958_v34 = vmul.f32 %v702_v23, %v702_v23  ;;  %v204_v22 = vld [vmem:[#allocation2 + $0x500] sm:$0xff] }
 0x119   :  { %v460_v23 = vld [vmem:[#allocation5 + $0x500] sm:$0xff] }
 0x11a   :  { %v1200_v44 = vadd.f32 %v1199_v39, %v945_v33  ;;  %v704_v33 = vsub.f32 %v192_v26, %v448_v27  ;;  %v959_v39 = vmul.f32 %v703_v28, %v703_v28  ;;  %v205_v27 = vld [vmem:[#allocation2 + $0x508] sm:$0xff] }
 0x11b   :  { %v461_v28 = vld [vmem:[#allocation5 + $0x508] sm:$0xff] }
 0x11c   :  { %v1201_v49 = vadd.f32 %v1200_v44, %v946_v38  ;;  %v705_v38 = vsub.f32 %v193_v31, %v449_v32  ;;  %v960_v44 = vmul.f32 %v704_v33, %v704_v33  ;;  %v206_v32 = vld [vmem:[#allocation2 + $0x510] sm:$0xff] }
 0x11d   :  { %v462_v33 = vld [vmem:[#allocation5 + $0x510] sm:$0xff] }
 0x11e   :  { %v1202_v54 = vadd.f32 %v1201_v49, %v947_v43  ;;  %v706_v43 = vsub.f32 %v194_v36, %v450_v37  ;;  %v961_v49 = vmul.f32 %v705_v38, %v705_v38  ;;  %v207_v37 = vld [vmem:[#allocation2 + $0x518] sm:$0xff] }
 0x11f   :  { %v463_v38 = vld [vmem:[#allocation5 + $0x518] sm:$0xff] }
 0x120   :  { %v1203_v59 = vadd.f32 %v1202_v54, %v948_v48  ;;  %v707_v48 = vsub.f32 %v195_v41, %v451_v42  ;;  %v962_v54 = vmul.f32 %v706_v43, %v706_v43  ;;  %v208_v42 = vld [vmem:[#allocation2 + $0x520] sm:$0xff] }
 0x121   :  { %v464_v43 = vld [vmem:[#allocation5 + $0x520] sm:$0xff] }
 0x122   :  { %v1204_v0 = vadd.f32 %v1203_v59, %v949_v53  ;;  %v708_v53 = vsub.f32 %v196_v46, %v452_v47  ;;  %v963_v59 = vmul.f32 %v707_v48, %v707_v48  ;;  %v209_v47 = vld [vmem:[#allocation2 + $0x528] sm:$0xff] }
 0x123   :  { %v465_v48 = vld [vmem:[#allocation5 + $0x528] sm:$0xff] }
 0x124   :  { %v1205_v5 = vadd.f32 %v1204_v0, %v950_v58  ;;  %v709_v58 = vsub.f32 %v197_v51, %v453_v52  ;;  %v964_v0 = vmul.f32 %v708_v53, %v708_v53  ;;  %v210_v52 = vld [vmem:[#allocation2 + $0x530] sm:$0xff] }
 0x125   :  { %v466_v53 = vld [vmem:[#allocation5 + $0x530] sm:$0xff] }
 0x126   :  { %v1206_v10 = vadd.f32 %v1205_v5, %v951_v63  ;;  %v710_v63 = vsub.f32 %v198_v56, %v454_v57  ;;  %v965_v5 = vmul.f32 %v709_v58, %v709_v58  ;;  %v211_v57 = vld [vmem:[#allocation2 + $0x538] sm:$0xff] }
 0x127   :  { %v467_v58 = vld [vmem:[#allocation5 + $0x538] sm:$0xff] }
 0x128   :  { %v1207_v15 = vadd.f32 %v1206_v10, %v952_v4  ;;  %v711_v4 = vsub.f32 %v199_v61, %v455_v62  ;;  %v966_v10 = vmul.f32 %v710_v63, %v710_v63  ;;  %v212_v62 = vld [vmem:[#allocation2 + $0x540] sm:$0xff] }
 0x129   :  { %v468_v63 = vld [vmem:[#allocation5 + $0x540] sm:$0xff] }
 0x12a   :  { %v1208_v20 = vadd.f32 %v1207_v15, %v953_v9  ;;  %v712_v9 = vsub.f32 %v200_v2, %v456_v3  ;;  %v967_v15 = vmul.f32 %v711_v4, %v711_v4  ;;  %v213_v3 = vld [vmem:[#allocation2 + $0x548] sm:$0xff] }
 0x12b   :  { %v469_v4 = vld [vmem:[#allocation5 + $0x548] sm:$0xff] }
 0x12c   :  { %v1209_v25 = vadd.f32 %v1208_v20, %v954_v14  ;;  %v713_v14 = vsub.f32 %v201_v7, %v457_v8  ;;  %v968_v20 = vmul.f32 %v712_v9, %v712_v9  ;;  %v214_v8 = vld [vmem:[#allocation2 + $0x550] sm:$0xff] }
 0x12d   :  { %v470_v9 = vld [vmem:[#allocation5 + $0x550] sm:$0xff] }
 0x12e   :  { %v1210_v30 = vadd.f32 %v1209_v25, %v955_v19  ;;  %v714_v19 = vsub.f32 %v202_v12, %v458_v13  ;;  %v969_v25 = vmul.f32 %v713_v14, %v713_v14  ;;  %v215_v13 = vld [vmem:[#allocation2 + $0x558] sm:$0xff] }
 0x12f   :  { %v471_v14 = vld [vmem:[#allocation5 + $0x558] sm:$0xff] }
 0x130   :  { %v1211_v35 = vadd.f32 %v1210_v30, %v956_v24  ;;  %v715_v24 = vsub.f32 %v203_v17, %v459_v18  ;;  %v970_v30 = vmul.f32 %v714_v19, %v714_v19  ;;  %v216_v18 = vld [vmem:[#allocation2 + $0x560] sm:$0xff] }
 0x131   :  { %v472_v19 = vld [vmem:[#allocation5 + $0x560] sm:$0xff] }
 0x132   :  { %v1212_v40 = vadd.f32 %v1211_v35, %v957_v29  ;;  %v716_v29 = vsub.f32 %v204_v22, %v460_v23  ;;  %v971_v35 = vmul.f32 %v715_v24, %v715_v24  ;;  %v217_v23 = vld [vmem:[#allocation2 + $0x568] sm:$0xff] }
 0x133   :  { %v473_v24 = vld [vmem:[#allocation5 + $0x568] sm:$0xff] }
 0x134   :  { %v1213_v45 = vadd.f32 %v1212_v40, %v958_v34  ;;  %v717_v34 = vsub.f32 %v205_v27, %v461_v28  ;;  %v972_v40 = vmul.f32 %v716_v29, %v716_v29  ;;  %v218_v28 = vld [vmem:[#allocation2 + $0x570] sm:$0xff] }
 0x135   :  { %v474_v29 = vld [vmem:[#allocation5 + $0x570] sm:$0xff] }
 0x136   :  { %v1214_v50 = vadd.f32 %v1213_v45, %v959_v39  ;;  %v718_v39 = vsub.f32 %v206_v32, %v462_v33  ;;  %v973_v45 = vmul.f32 %v717_v34, %v717_v34  ;;  %v219_v33 = vld [vmem:[#allocation2 + $0x578] sm:$0xff] }
 0x137   :  { %v475_v34 = vld [vmem:[#allocation5 + $0x578] sm:$0xff] }
 0x138   :  { %v1215_v55 = vadd.f32 %v1214_v50, %v960_v44  ;;  %v719_v44 = vsub.f32 %v207_v37, %v463_v38  ;;  %v974_v50 = vmul.f32 %v718_v39, %v718_v39  ;;  %v220_v38 = vld [vmem:[#allocation2 + $0x580] sm:$0xff] }
 0x139   :  { %v476_v39 = vld [vmem:[#allocation5 + $0x580] sm:$0xff] }
 0x13a   :  { %v1216_v60 = vadd.f32 %v1215_v55, %v961_v49  ;;  %v720_v49 = vsub.f32 %v208_v42, %v464_v43  ;;  %v975_v55 = vmul.f32 %v719_v44, %v719_v44  ;;  %v221_v43 = vld [vmem:[#allocation2 + $0x588] sm:$0xff] }
 0x13b   :  { %v477_v44 = vld [vmem:[#allocation5 + $0x588] sm:$0xff] }
 0x13c   :  { %v1217_v1 = vadd.f32 %v1216_v60, %v962_v54  ;;  %v721_v54 = vsub.f32 %v209_v47, %v465_v48  ;;  %v976_v60 = vmul.f32 %v720_v49, %v720_v49  ;;  %v222_v48 = vld [vmem:[#allocation2 + $0x590] sm:$0xff] }
 0x13d   :  { %v478_v49 = vld [vmem:[#allocation5 + $0x590] sm:$0xff] }
 0x13e   :  { %v1218_v6 = vadd.f32 %v1217_v1, %v963_v59  ;;  %v722_v59 = vsub.f32 %v210_v52, %v466_v53  ;;  %v977_v1 = vmul.f32 %v721_v54, %v721_v54  ;;  %v223_v53 = vld [vmem:[#allocation2 + $0x598] sm:$0xff] }
 0x13f   :  { %v479_v54 = vld [vmem:[#allocation5 + $0x598] sm:$0xff] }
 0x140   :  { %v1219_v11 = vadd.f32 %v1218_v6, %v964_v0  ;;  %v723_v0 = vsub.f32 %v211_v57, %v467_v58  ;;  %v978_v6 = vmul.f32 %v722_v59, %v722_v59  ;;  %v224_v58 = vld [vmem:[#allocation2 + $0x5a0] sm:$0xff] }
 0x141   :  { %v480_v59 = vld [vmem:[#allocation5 + $0x5a0] sm:$0xff] }
 0x142   :  { %v1220_v16 = vadd.f32 %v1219_v11, %v965_v5  ;;  %v724_v5 = vsub.f32 %v212_v62, %v468_v63  ;;  %v979_v11 = vmul.f32 %v723_v0, %v723_v0  ;;  %v225_v63 = vld [vmem:[#allocation2 + $0x5a8] sm:$0xff] }
 0x143   :  { %v481_v0 = vld [vmem:[#allocation5 + $0x5a8] sm:$0xff] }
 0x144   :  { %v1221_v21 = vadd.f32 %v1220_v16, %v966_v10  ;;  %v725_v10 = vsub.f32 %v213_v3, %v469_v4  ;;  %v980_v16 = vmul.f32 %v724_v5, %v724_v5  ;;  %v226_v4 = vld [vmem:[#allocation2 + $0x5b0] sm:$0xff] }
 0x145   :  { %v482_v5 = vld [vmem:[#allocation5 + $0x5b0] sm:$0xff] }
 0x146   :  { %v1222_v26 = vadd.f32 %v1221_v21, %v967_v15  ;;  %v726_v15 = vsub.f32 %v214_v8, %v470_v9  ;;  %v981_v21 = vmul.f32 %v725_v10, %v725_v10  ;;  %v227_v9 = vld [vmem:[#allocation2 + $0x5b8] sm:$0xff] }
 0x147   :  { %v483_v10 = vld [vmem:[#allocation5 + $0x5b8] sm:$0xff] }
 0x148   :  { %v1223_v31 = vadd.f32 %v1222_v26, %v968_v20  ;;  %v727_v20 = vsub.f32 %v215_v13, %v471_v14  ;;  %v982_v26 = vmul.f32 %v726_v15, %v726_v15  ;;  %v228_v14 = vld [vmem:[#allocation2 + $0x5c0] sm:$0xff] }
 0x149   :  { %v484_v15 = vld [vmem:[#allocation5 + $0x5c0] sm:$0xff] }
 0x14a   :  { %v1224_v36 = vadd.f32 %v1223_v31, %v969_v25  ;;  %v728_v25 = vsub.f32 %v216_v18, %v472_v19  ;;  %v983_v31 = vmul.f32 %v727_v20, %v727_v20  ;;  %v229_v19 = vld [vmem:[#allocation2 + $0x5c8] sm:$0xff] }
 0x14b   :  { %v485_v20 = vld [vmem:[#allocation5 + $0x5c8] sm:$0xff] }
 0x14c   :  { %v1225_v41 = vadd.f32 %v1224_v36, %v970_v30  ;;  %v729_v30 = vsub.f32 %v217_v23, %v473_v24  ;;  %v984_v36 = vmul.f32 %v728_v25, %v728_v25  ;;  %v230_v24 = vld [vmem:[#allocation2 + $0x5d0] sm:$0xff] }
 0x14d   :  { %v486_v25 = vld [vmem:[#allocation5 + $0x5d0] sm:$0xff] }
 0x14e   :  { %v1226_v46 = vadd.f32 %v1225_v41, %v971_v35  ;;  %v730_v35 = vsub.f32 %v218_v28, %v474_v29  ;;  %v985_v41 = vmul.f32 %v729_v30, %v729_v30  ;;  %v231_v29 = vld [vmem:[#allocation2 + $0x5d8] sm:$0xff] }
 0x14f   :  { %v487_v30 = vld [vmem:[#allocation5 + $0x5d8] sm:$0xff] }
 0x150   :  { %v1227_v51 = vadd.f32 %v1226_v46, %v972_v40  ;;  %v731_v40 = vsub.f32 %v219_v33, %v475_v34  ;;  %v986_v46 = vmul.f32 %v730_v35, %v730_v35  ;;  %v232_v34 = vld [vmem:[#allocation2 + $0x5e0] sm:$0xff] }
 0x151   :  { %v488_v35 = vld [vmem:[#allocation5 + $0x5e0] sm:$0xff] }
 0x152   :  { %v1228_v56 = vadd.f32 %v1227_v51, %v973_v45  ;;  %v732_v45 = vsub.f32 %v220_v38, %v476_v39  ;;  %v987_v51 = vmul.f32 %v731_v40, %v731_v40  ;;  %v233_v39 = vld [vmem:[#allocation2 + $0x5e8] sm:$0xff] }
 0x153   :  { %v489_v40 = vld [vmem:[#allocation5 + $0x5e8] sm:$0xff] }
 0x154   :  { %v1229_v61 = vadd.f32 %v1228_v56, %v974_v50  ;;  %v733_v50 = vsub.f32 %v221_v43, %v477_v44  ;;  %v988_v56 = vmul.f32 %v732_v45, %v732_v45  ;;  %v234_v44 = vld [vmem:[#allocation2 + $0x5f0] sm:$0xff] }
 0x155   :  { %v490_v45 = vld [vmem:[#allocation5 + $0x5f0] sm:$0xff] }
 0x156   :  { %v1230_v2 = vadd.f32 %v1229_v61, %v975_v55  ;;  %v734_v55 = vsub.f32 %v222_v48, %v478_v49  ;;  %v989_v61 = vmul.f32 %v733_v50, %v733_v50  ;;  %v235_v49 = vld [vmem:[#allocation2 + $0x5f8] sm:$0xff] }
 0x157   :  { %v491_v50 = vld [vmem:[#allocation5 + $0x5f8] sm:$0xff] }
 0x158   :  { %v1231_v7 = vadd.f32 %v1230_v2, %v976_v60  ;;  %v735_v60 = vsub.f32 %v223_v53, %v479_v54  ;;  %v990_v2 = vmul.f32 %v734_v55, %v734_v55  ;;  %v236_v54 = vld [vmem:[#allocation2 + $0x600] sm:$0xff] }
 0x159   :  { %v492_v55 = vld [vmem:[#allocation5 + $0x600] sm:$0xff] }
 0x15a   :  { %v1232_v12 = vadd.f32 %v1231_v7, %v977_v1  ;;  %v736_v1 = vsub.f32 %v224_v58, %v480_v59  ;;  %v991_v7 = vmul.f32 %v735_v60, %v735_v60  ;;  %v237_v59 = vld [vmem:[#allocation2 + $0x608] sm:$0xff] }
 0x15b   :  { %v493_v60 = vld [vmem:[#allocation5 + $0x608] sm:$0xff] }
 0x15c   :  { %v1233_v17 = vadd.f32 %v1232_v12, %v978_v6  ;;  %v737_v6 = vsub.f32 %v225_v63, %v481_v0  ;;  %v992_v12 = vmul.f32 %v736_v1, %v736_v1  ;;  %v238_v0 = vld [vmem:[#allocation2 + $0x610] sm:$0xff] }
 0x15d   :  { %v494_v1 = vld [vmem:[#allocation5 + $0x610] sm:$0xff] }
 0x15e   :  { %v1234_v22 = vadd.f32 %v1233_v17, %v979_v11  ;;  %v738_v11 = vsub.f32 %v226_v4, %v482_v5  ;;  %v993_v17 = vmul.f32 %v737_v6, %v737_v6  ;;  %v239_v5 = vld [vmem:[#allocation2 + $0x618] sm:$0xff] }
 0x15f   :  { %v495_v6 = vld [vmem:[#allocation5 + $0x618] sm:$0xff] }
 0x160   :  { %v1235_v27 = vadd.f32 %v1234_v22, %v980_v16  ;;  %v739_v16 = vsub.f32 %v227_v9, %v483_v10  ;;  %v994_v22 = vmul.f32 %v738_v11, %v738_v11  ;;  %v240_v10 = vld [vmem:[#allocation2 + $0x620] sm:$0xff] }
 0x161   :  { %v496_v11 = vld [vmem:[#allocation5 + $0x620] sm:$0xff] }
 0x162   :  { %v1236_v32 = vadd.f32 %v1235_v27, %v981_v21  ;;  %v740_v21 = vsub.f32 %v228_v14, %v484_v15  ;;  %v995_v27 = vmul.f32 %v739_v16, %v739_v16  ;;  %v241_v15 = vld [vmem:[#allocation2 + $0x628] sm:$0xff] }
 0x163   :  { %v497_v16 = vld [vmem:[#allocation5 + $0x628] sm:$0xff] }
 0x164   :  { %v1237_v37 = vadd.f32 %v1236_v32, %v982_v26  ;;  %v741_v26 = vsub.f32 %v229_v19, %v485_v20  ;;  %v996_v32 = vmul.f32 %v740_v21, %v740_v21  ;;  %v242_v20 = vld [vmem:[#allocation2 + $0x630] sm:$0xff] }
 0x165   :  { %v498_v21 = vld [vmem:[#allocation5 + $0x630] sm:$0xff] }
 0x166   :  { %v1238_v42 = vadd.f32 %v1237_v37, %v983_v31  ;;  %v742_v31 = vsub.f32 %v230_v24, %v486_v25  ;;  %v997_v37 = vmul.f32 %v741_v26, %v741_v26  ;;  %v243_v25 = vld [vmem:[#allocation2 + $0x638] sm:$0xff] }
 0x167   :  { %v499_v26 = vld [vmem:[#allocation5 + $0x638] sm:$0xff] }
 0x168   :  { %v1239_v47 = vadd.f32 %v1238_v42, %v984_v36  ;;  %v743_v36 = vsub.f32 %v231_v29, %v487_v30  ;;  %v998_v42 = vmul.f32 %v742_v31, %v742_v31  ;;  %v244_v30 = vld [vmem:[#allocation2 + $0x640] sm:$0xff] }
 0x169   :  { %v500_v31 = vld [vmem:[#allocation5 + $0x640] sm:$0xff] }
 0x16a   :  { %v1240_v52 = vadd.f32 %v1239_v47, %v985_v41  ;;  %v744_v41 = vsub.f32 %v232_v34, %v488_v35  ;;  %v999_v47 = vmul.f32 %v743_v36, %v743_v36  ;;  %v245_v35 = vld [vmem:[#allocation2 + $0x648] sm:$0xff] }
 0x16b   :  { %v501_v36 = vld [vmem:[#allocation5 + $0x648] sm:$0xff] }
 0x16c   :  { %v1241_v57 = vadd.f32 %v1240_v52, %v986_v46  ;;  %v745_v46 = vsub.f32 %v233_v39, %v489_v40  ;;  %v1000_v52 = vmul.f32 %v744_v41, %v744_v41  ;;  %v246_v40 = vld [vmem:[#allocation2 + $0x650] sm:$0xff] }
 0x16d   :  { %v502_v41 = vld [vmem:[#allocation5 + $0x650] sm:$0xff] }
 0x16e   :  { %v1242_v62 = vadd.f32 %v1241_v57, %v987_v51  ;;  %v746_v51 = vsub.f32 %v234_v44, %v490_v45  ;;  %v1001_v57 = vmul.f32 %v745_v46, %v745_v46  ;;  %v247_v45 = vld [vmem:[#allocation2 + $0x658] sm:$0xff] }
 0x16f   :  { %v503_v46 = vld [vmem:[#allocation5 + $0x658] sm:$0xff] }
 0x170   :  { %v1243_v3 = vadd.f32 %v1242_v62, %v988_v56  ;;  %v747_v56 = vsub.f32 %v235_v49, %v491_v50  ;;  %v1002_v62 = vmul.f32 %v746_v51, %v746_v51  ;;  %v248_v50 = vld [vmem:[#allocation2 + $0x660] sm:$0xff] }
 0x171   :  { %v504_v51 = vld [vmem:[#allocation5 + $0x660] sm:$0xff] }
 0x172   :  { %v1244_v8 = vadd.f32 %v1243_v3, %v989_v61  ;;  %v748_v61 = vsub.f32 %v236_v54, %v492_v55  ;;  %v1003_v3 = vmul.f32 %v747_v56, %v747_v56  ;;  %v249_v55 = vld [vmem:[#allocation2 + $0x668] sm:$0xff] }
 0x173   :  { %v505_v56 = vld [vmem:[#allocation5 + $0x668] sm:$0xff] }
 0x174   :  { %v1245_v13 = vadd.f32 %v1244_v8, %v990_v2  ;;  %v749_v2 = vsub.f32 %v237_v59, %v493_v60  ;;  %v1004_v8 = vmul.f32 %v748_v61, %v748_v61  ;;  %v250_v60 = vld [vmem:[#allocation2 + $0x670] sm:$0xff] }
 0x175   :  { %v506_v61 = vld [vmem:[#allocation5 + $0x670] sm:$0xff] }
 0x176   :  { %v1246_v18 = vadd.f32 %v1245_v13, %v991_v7  ;;  %v750_v7 = vsub.f32 %v238_v0, %v494_v1  ;;  %v1005_v13 = vmul.f32 %v749_v2, %v749_v2  ;;  %v251_v1 = vld [vmem:[#allocation2 + $0x678] sm:$0xff] }
 0x177   :  { %v507_v2 = vld [vmem:[#allocation5 + $0x678] sm:$0xff] }
 0x178   :  { %v1247_v23 = vadd.f32 %v1246_v18, %v992_v12  ;;  %v751_v12 = vsub.f32 %v239_v5, %v495_v6  ;;  %v1006_v18 = vmul.f32 %v750_v7, %v750_v7  ;;  %v252_v6 = vld [vmem:[#allocation2 + $0x680] sm:$0xff] }
 0x179   :  { %v508_v7 = vld [vmem:[#allocation5 + $0x680] sm:$0xff] }
 0x17a   :  { %v1248_v28 = vadd.f32 %v1247_v23, %v993_v17  ;;  %v752_v17 = vsub.f32 %v240_v10, %v496_v11  ;;  %v1007_v23 = vmul.f32 %v751_v12, %v751_v12  ;;  %v253_v11 = vld [vmem:[#allocation2 + $0x688] sm:$0xff] }
 0x17b   :  { %v509_v12 = vld [vmem:[#allocation5 + $0x688] sm:$0xff] }
 0x17c   :  { %v1249_v33 = vadd.f32 %v1248_v28, %v994_v22  ;;  %v753_v22 = vsub.f32 %v241_v15, %v497_v16  ;;  %v1008_v28 = vmul.f32 %v752_v17, %v752_v17  ;;  %v254_v16 = vld [vmem:[#allocation2 + $0x690] sm:$0xff] }
 0x17d   :  { %v510_v17 = vld [vmem:[#allocation5 + $0x690] sm:$0xff] }
 0x17e   :  { %v1250_v38 = vadd.f32 %v1249_v33, %v995_v27  ;;  %v754_v27 = vsub.f32 %v242_v20, %v498_v21  ;;  %v1009_v33 = vmul.f32 %v753_v22, %v753_v22  ;;  %v255_v21 = vld [vmem:[#allocation2 + $0x698] sm:$0xff] }
 0x17f   :  { %v511_v22 = vld [vmem:[#allocation5 + $0x698] sm:$0xff] }
 0x180   :  { %v1251_v43 = vadd.f32 %v1250_v38, %v996_v32  ;;  %v755_v32 = vsub.f32 %v243_v25, %v499_v26  ;;  %v1010_v38 = vmul.f32 %v754_v27, %v754_v27  ;;  %v256_v26 = vld [vmem:[#allocation2 + $0x6a0] sm:$0xff] }
 0x181   :  { %v512_v27 = vld [vmem:[#allocation5 + $0x6a0] sm:$0xff] }
 0x182   :  { %v1252_v48 = vadd.f32 %v1251_v43, %v997_v37  ;;  %v756_v37 = vsub.f32 %v244_v30, %v500_v31  ;;  %v1011_v43 = vmul.f32 %v755_v32, %v755_v32  ;;  %v257_v31 = vld [vmem:[#allocation2 + $0x6a8] sm:$0xff] }
 0x183   :  { %v513_v32 = vld [vmem:[#allocation5 + $0x6a8] sm:$0xff] }
 0x184   :  { %v1253_v53 = vadd.f32 %v1252_v48, %v998_v42  ;;  %v757_v42 = vsub.f32 %v245_v35, %v501_v36  ;;  %v1012_v48 = vmul.f32 %v756_v37, %v756_v37  ;;  %v258_v36 = vld [vmem:[#allocation2 + $0x6b0] sm:$0xff] }
 0x185   :  { %v514_v37 = vld [vmem:[#allocation5 + $0x6b0] sm:$0xff] }
 0x186   :  { %v1254_v58 = vadd.f32 %v1253_v53, %v999_v47  ;;  %v758_v47 = vsub.f32 %v246_v40, %v502_v41  ;;  %v1013_v53 = vmul.f32 %v757_v42, %v757_v42  ;;  %v259_v41 = vld [vmem:[#allocation2 + $0x6b8] sm:$0xff] }
 0x187   :  { %v515_v42 = vld [vmem:[#allocation5 + $0x6b8] sm:$0xff] }
 0x188   :  { %v1255_v63 = vadd.f32 %v1254_v58, %v1000_v52  ;;  %v759_v52 = vsub.f32 %v247_v45, %v503_v46  ;;  %v1014_v58 = vmul.f32 %v758_v47, %v758_v47  ;;  %v260_v46 = vld [vmem:[#allocation2 + $0x6c0] sm:$0xff] }
 0x189   :  { %v516_v47 = vld [vmem:[#allocation5 + $0x6c0] sm:$0xff] }
 0x18a   :  { %v1256_v4 = vadd.f32 %v1255_v63, %v1001_v57  ;;  %v760_v57 = vsub.f32 %v248_v50, %v504_v51  ;;  %v1015_v63 = vmul.f32 %v759_v52, %v759_v52  ;;  %v261_v51 = vld [vmem:[#allocation2 + $0x6c8] sm:$0xff] }
 0x18b   :  { %v517_v52 = vld [vmem:[#allocation5 + $0x6c8] sm:$0xff] }
 0x18c   :  { %v1257_v9 = vadd.f32 %v1256_v4, %v1002_v62  ;;  %v761_v62 = vsub.f32 %v249_v55, %v505_v56  ;;  %v1016_v4 = vmul.f32 %v760_v57, %v760_v57  ;;  %v262_v56 = vld [vmem:[#allocation2 + $0x6d0] sm:$0xff] }
 0x18d   :  { %v518_v57 = vld [vmem:[#allocation5 + $0x6d0] sm:$0xff] }
 0x18e   :  { %v1258_v14 = vadd.f32 %v1257_v9, %v1003_v3  ;;  %v762_v3 = vsub.f32 %v250_v60, %v506_v61  ;;  %v1017_v9 = vmul.f32 %v761_v62, %v761_v62  ;;  %v263_v61 = vld [vmem:[#allocation2 + $0x6d8] sm:$0xff] }
 0x18f   :  { %v519_v62 = vld [vmem:[#allocation5 + $0x6d8] sm:$0xff] }
 0x190   :  { %v1259_v19 = vadd.f32 %v1258_v14, %v1004_v8  ;;  %v763_v8 = vsub.f32 %v251_v1, %v507_v2  ;;  %v1018_v14 = vmul.f32 %v762_v3, %v762_v3  ;;  %v264_v2 = vld [vmem:[#allocation2 + $0x6e0] sm:$0xff] }
 0x191   :  { %v520_v3 = vld [vmem:[#allocation5 + $0x6e0] sm:$0xff] }
 0x192   :  { %v1260_v24 = vadd.f32 %v1259_v19, %v1005_v13  ;;  %v764_v13 = vsub.f32 %v252_v6, %v508_v7  ;;  %v1019_v19 = vmul.f32 %v763_v8, %v763_v8  ;;  %v265_v7 = vld [vmem:[#allocation2 + $0x6e8] sm:$0xff] }
 0x193   :  { %v521_v8 = vld [vmem:[#allocation5 + $0x6e8] sm:$0xff] }
 0x194   :  { %v1261_v29 = vadd.f32 %v1260_v24, %v1006_v18  ;;  %v765_v18 = vsub.f32 %v253_v11, %v509_v12  ;;  %v1020_v24 = vmul.f32 %v764_v13, %v764_v13  ;;  %v266_v12 = vld [vmem:[#allocation2 + $0x6f0] sm:$0xff] }
 0x195   :  { %v522_v13 = vld [vmem:[#allocation5 + $0x6f0] sm:$0xff] }
 0x196   :  { %v1262_v34 = vadd.f32 %v1261_v29, %v1007_v23  ;;  %v766_v23 = vsub.f32 %v254_v16, %v510_v17  ;;  %v1021_v29 = vmul.f32 %v765_v18, %v765_v18  ;;  %v267_v17 = vld [vmem:[#allocation2 + $0x6f8] sm:$0xff] }
 0x197   :  { %v523_v18 = vld [vmem:[#allocation5 + $0x6f8] sm:$0xff] }
 0x198   :  { %v1263_v39 = vadd.f32 %v1262_v34, %v1008_v28  ;;  %v767_v28 = vsub.f32 %v255_v21, %v511_v22  ;;  %v1022_v34 = vmul.f32 %v766_v23, %v766_v23  ;;  %v268_v22 = vld [vmem:[#allocation2 + $0x700] sm:$0xff] }
 0x199   :  { %v524_v23 = vld [vmem:[#allocation5 + $0x700] sm:$0xff] }
 0x19a   :  { %v1264_v44 = vadd.f32 %v1263_v39, %v1009_v33  ;;  %v768_v33 = vsub.f32 %v256_v26, %v512_v27  ;;  %v1023_v39 = vmul.f32 %v767_v28, %v767_v28  ;;  %v269_v27 = vld [vmem:[#allocation2 + $0x708] sm:$0xff] }
 0x19b   :  { %v525_v28 = vld [vmem:[#allocation5 + $0x708] sm:$0xff] }
 0x19c   :  { %v1265_v49 = vadd.f32 %v1264_v44, %v1010_v38  ;;  %v769_v38 = vsub.f32 %v257_v31, %v513_v32  ;;  %v1024_v44 = vmul.f32 %v768_v33, %v768_v33  ;;  %v270_v32 = vld [vmem:[#allocation2 + $0x710] sm:$0xff] }
 0x19d   :  { %v526_v33 = vld [vmem:[#allocation5 + $0x710] sm:$0xff] }
 0x19e   :  { %v1266_v54 = vadd.f32 %v1265_v49, %v1011_v43  ;;  %v770_v43 = vsub.f32 %v258_v36, %v514_v37  ;;  %v1025_v49 = vmul.f32 %v769_v38, %v769_v38  ;;  %v271_v37 = vld [vmem:[#allocation2 + $0x718] sm:$0xff] }
 0x19f   :  { %v527_v38 = vld [vmem:[#allocation5 + $0x718] sm:$0xff] }
 0x1a0   :  { %v1267_v59 = vadd.f32 %v1266_v54, %v1012_v48  ;;  %v771_v48 = vsub.f32 %v259_v41, %v515_v42  ;;  %v1026_v54 = vmul.f32 %v770_v43, %v770_v43  ;;  %v272_v42 = vld [vmem:[#allocation2 + $0x720] sm:$0xff] }
 0x1a1   :  { %v528_v43 = vld [vmem:[#allocation5 + $0x720] sm:$0xff] }
 0x1a2   :  { %v1268_v0 = vadd.f32 %v1267_v59, %v1013_v53  ;;  %v772_v53 = vsub.f32 %v260_v46, %v516_v47  ;;  %v1027_v59 = vmul.f32 %v771_v48, %v771_v48  ;;  %v273_v47 = vld [vmem:[#allocation2 + $0x728] sm:$0xff] }
 0x1a3   :  { %v529_v48 = vld [vmem:[#allocation5 + $0x728] sm:$0xff] }
 0x1a4   :  { %v1269_v5 = vadd.f32 %v1268_v0, %v1014_v58  ;;  %v773_v58 = vsub.f32 %v261_v51, %v517_v52  ;;  %v1028_v0 = vmul.f32 %v772_v53, %v772_v53  ;;  %v274_v52 = vld [vmem:[#allocation2 + $0x730] sm:$0xff] }
 0x1a5   :  { %v530_v53 = vld [vmem:[#allocation5 + $0x730] sm:$0xff] }
 0x1a6   :  { %v1270_v10 = vadd.f32 %v1269_v5, %v1015_v63  ;;  %v774_v63 = vsub.f32 %v262_v56, %v518_v57  ;;  %v1029_v5 = vmul.f32 %v773_v58, %v773_v58  ;;  %v275_v57 = vld [vmem:[#allocation2 + $0x738] sm:$0xff] }
 0x1a7   :  { %v531_v58 = vld [vmem:[#allocation5 + $0x738] sm:$0xff] }
 0x1a8   :  { %v1271_v15 = vadd.f32 %v1270_v10, %v1016_v4  ;;  %v775_v4 = vsub.f32 %v263_v61, %v519_v62  ;;  %v1030_v10 = vmul.f32 %v774_v63, %v774_v63  ;;  %v276_v62 = vld [vmem:[#allocation2 + $0x740] sm:$0xff] }
 0x1a9   :  { %v532_v63 = vld [vmem:[#allocation5 + $0x740] sm:$0xff] }
 0x1aa   :  { %v1272_v20 = vadd.f32 %v1271_v15, %v1017_v9  ;;  %v776_v9 = vsub.f32 %v264_v2, %v520_v3  ;;  %v1031_v15 = vmul.f32 %v775_v4, %v775_v4  ;;  %v277_v3 = vld [vmem:[#allocation2 + $0x748] sm:$0xff] }
 0x1ab   :  { %v533_v4 = vld [vmem:[#allocation5 + $0x748] sm:$0xff] }
 0x1ac   :  { %v1273_v25 = vadd.f32 %v1272_v20, %v1018_v14  ;;  %v777_v14 = vsub.f32 %v265_v7, %v521_v8  ;;  %v1032_v20 = vmul.f32 %v776_v9, %v776_v9  ;;  %v278_v8 = vld [vmem:[#allocation2 + $0x750] sm:$0xff] }
 0x1ad   :  { %v534_v9 = vld [vmem:[#allocation5 + $0x750] sm:$0xff] }
 0x1ae   :  { %v1274_v30 = vadd.f32 %v1273_v25, %v1019_v19  ;;  %v778_v19 = vsub.f32 %v266_v12, %v522_v13  ;;  %v1033_v25 = vmul.f32 %v777_v14, %v777_v14  ;;  %v279_v13 = vld [vmem:[#allocation2 + $0x758] sm:$0xff] }
 0x1af   :  { %v535_v14 = vld [vmem:[#allocation5 + $0x758] sm:$0xff] }
 0x1b0   :  { %v1275_v35 = vadd.f32 %v1274_v30, %v1020_v24  ;;  %v779_v24 = vsub.f32 %v267_v17, %v523_v18  ;;  %v1034_v30 = vmul.f32 %v778_v19, %v778_v19  ;;  %v280_v18 = vld [vmem:[#allocation2 + $0x760] sm:$0xff] }
 0x1b1   :  { %v536_v19 = vld [vmem:[#allocation5 + $0x760] sm:$0xff] }
 0x1b2   :  { %v1276_v40 = vadd.f32 %v1275_v35, %v1021_v29  ;;  %v780_v29 = vsub.f32 %v268_v22, %v524_v23  ;;  %v1035_v35 = vmul.f32 %v779_v24, %v779_v24  ;;  %v281_v23 = vld [vmem:[#allocation2 + $0x768] sm:$0xff] }
 0x1b3   :  { %v537_v24 = vld [vmem:[#allocation5 + $0x768] sm:$0xff] }
 0x1b4   :  { %v1277_v45 = vadd.f32 %v1276_v40, %v1022_v34  ;;  %v781_v34 = vsub.f32 %v269_v27, %v525_v28  ;;  %v1036_v40 = vmul.f32 %v780_v29, %v780_v29  ;;  %v282_v28 = vld [vmem:[#allocation2 + $0x770] sm:$0xff] }
 0x1b5   :  { %v538_v29 = vld [vmem:[#allocation5 + $0x770] sm:$0xff] }
 0x1b6   :  { %v1278_v50 = vadd.f32 %v1277_v45, %v1023_v39  ;;  %v782_v39 = vsub.f32 %v270_v32, %v526_v33  ;;  %v1037_v45 = vmul.f32 %v781_v34, %v781_v34  ;;  %v283_v33 = vld [vmem:[#allocation2 + $0x778] sm:$0xff] }
 0x1b7   :  { %v539_v34 = vld [vmem:[#allocation5 + $0x778] sm:$0xff] }
 0x1b8   :  { %v1279_v55 = vadd.f32 %v1278_v50, %v1024_v44  ;;  %v783_v44 = vsub.f32 %v271_v37, %v527_v38  ;;  %v1038_v50 = vmul.f32 %v782_v39, %v782_v39  ;;  %v284_v38 = vld [vmem:[#allocation2 + $0x780] sm:$0xff] }
 0x1b9   :  { %v540_v39 = vld [vmem:[#allocation5 + $0x780] sm:$0xff] }
 0x1ba   :  { %v1280_v60 = vadd.f32 %v1279_v55, %v1025_v49  ;;  %v784_v49 = vsub.f32 %v272_v42, %v528_v43  ;;  %v1039_v55 = vmul.f32 %v783_v44, %v783_v44  ;;  %v285_v43 = vld [vmem:[#allocation2 + $0x788] sm:$0xff] }
 0x1bb   :  { %v541_v44 = vld [vmem:[#allocation5 + $0x788] sm:$0xff] }
 0x1bc   :  { %v1281_v1 = vadd.f32 %v1280_v60, %v1026_v54  ;;  %v785_v54 = vsub.f32 %v273_v47, %v529_v48  ;;  %v1040_v60 = vmul.f32 %v784_v49, %v784_v49  ;;  %v286_v48 = vld [vmem:[#allocation2 + $0x790] sm:$0xff] }
 0x1bd   :  { %v542_v49 = vld [vmem:[#allocation5 + $0x790] sm:$0xff] }
 0x1be   :  { %v1282_v6 = vadd.f32 %v1281_v1, %v1027_v59  ;;  %v786_v59 = vsub.f32 %v274_v52, %v530_v53  ;;  %v1041_v1 = vmul.f32 %v785_v54, %v785_v54  ;;  %v287_v53 = vld [vmem:[#allocation2 + $0x798] sm:$0xff] }
 0x1bf   :  { %v543_v54 = vld [vmem:[#allocation5 + $0x798] sm:$0xff] }
 0x1c0   :  { %v1283_v11 = vadd.f32 %v1282_v6, %v1028_v0  ;;  %v787_v0 = vsub.f32 %v275_v57, %v531_v58  ;;  %v1042_v6 = vmul.f32 %v786_v59, %v786_v59  ;;  %v288_v58 = vld [vmem:[#allocation2 + $0x7a0] sm:$0xff] }
 0x1c1   :  { %v544_v59 = vld [vmem:[#allocation5 + $0x7a0] sm:$0xff] }
 0x1c2   :  { %v1284_v16 = vadd.f32 %v1283_v11, %v1029_v5  ;;  %v788_v5 = vsub.f32 %v276_v62, %v532_v63  ;;  %v1043_v11 = vmul.f32 %v787_v0, %v787_v0  ;;  %v289_v63 = vld [vmem:[#allocation2 + $0x7a8] sm:$0xff] }
 0x1c3   :  { %v545_v0 = vld [vmem:[#allocation5 + $0x7a8] sm:$0xff] }
 0x1c4   :  { %v1285_v21 = vadd.f32 %v1284_v16, %v1030_v10  ;;  %v789_v10 = vsub.f32 %v277_v3, %v533_v4  ;;  %v1044_v16 = vmul.f32 %v788_v5, %v788_v5  ;;  %v290_v4 = vld [vmem:[#allocation2 + $0x7b0] sm:$0xff] }
 0x1c5   :  { %v546_v5 = vld [vmem:[#allocation5 + $0x7b0] sm:$0xff] }
 0x1c6   :  { %v1286_v26 = vadd.f32 %v1285_v21, %v1031_v15  ;;  %v790_v15 = vsub.f32 %v278_v8, %v534_v9  ;;  %v1045_v21 = vmul.f32 %v789_v10, %v789_v10  ;;  %v291_v9 = vld [vmem:[#allocation2 + $0x7b8] sm:$0xff] }
 0x1c7   :  { %v547_v10 = vld [vmem:[#allocation5 + $0x7b8] sm:$0xff] }
 0x1c8   :  { %v1287_v31 = vadd.f32 %v1286_v26, %v1032_v20  ;;  %v791_v20 = vsub.f32 %v279_v13, %v535_v14  ;;  %v1046_v26 = vmul.f32 %v790_v15, %v790_v15  ;;  %v292_v14 = vld [vmem:[#allocation2 + $0x7c0] sm:$0xff] }
 0x1c9   :  { %v548_v15 = vld [vmem:[#allocation5 + $0x7c0] sm:$0xff] }
 0x1ca   :  { %v1288_v36 = vadd.f32 %v1287_v31, %v1033_v25  ;;  %v792_v25 = vsub.f32 %v280_v18, %v536_v19  ;;  %v1047_v31 = vmul.f32 %v791_v20, %v791_v20  ;;  %v293_v19 = vld [vmem:[#allocation2 + $0x7c8] sm:$0xff] }
 0x1cb   :  { %v549_v20 = vld [vmem:[#allocation5 + $0x7c8] sm:$0xff] }
 0x1cc   :  { %v1289_v41 = vadd.f32 %v1288_v36, %v1034_v30  ;;  %v793_v30 = vsub.f32 %v281_v23, %v537_v24  ;;  %v1048_v36 = vmul.f32 %v792_v25, %v792_v25  ;;  %v294_v24 = vld [vmem:[#allocation2 + $0x7d0] sm:$0xff] }
 0x1cd   :  { %v550_v25 = vld [vmem:[#allocation5 + $0x7d0] sm:$0xff] }
 0x1ce   :  { %v1290_v46 = vadd.f32 %v1289_v41, %v1035_v35  ;;  %v794_v35 = vsub.f32 %v282_v28, %v538_v29  ;;  %v1049_v41 = vmul.f32 %v793_v30, %v793_v30  ;;  %v295_v29 = vld [vmem:[#allocation2 + $0x7d8] sm:$0xff] }
 0x1cf   :  { %v551_v30 = vld [vmem:[#allocation5 + $0x7d8] sm:$0xff] }
 0x1d0   :  { %v1291_v51 = vadd.f32 %v1290_v46, %v1036_v40  ;;  %v795_v40 = vsub.f32 %v283_v33, %v539_v34  ;;  %v1050_v46 = vmul.f32 %v794_v35, %v794_v35  ;;  %v296_v34 = vld [vmem:[#allocation2 + $0x7e0] sm:$0xff] }
 0x1d1   :  { %v552_v35 = vld [vmem:[#allocation5 + $0x7e0] sm:$0xff] }
 0x1d2   :  { %v1292_v56 = vadd.f32 %v1291_v51, %v1037_v45  ;;  %v796_v45 = vsub.f32 %v284_v38, %v540_v39  ;;  %v1051_v51 = vmul.f32 %v795_v40, %v795_v40  ;;  %v297_v39 = vld [vmem:[#allocation2 + $0x7e8] sm:$0xff] }
 0x1d3   :  { %v553_v40 = vld [vmem:[#allocation5 + $0x7e8] sm:$0xff] }
 0x1d4   :  { %v1293_v61 = vadd.f32 %v1292_v56, %v1038_v50  ;;  %v797_v50 = vsub.f32 %v285_v43, %v541_v44  ;;  %v1052_v56 = vmul.f32 %v796_v45, %v796_v45  ;;  %v298_v44 = vld [vmem:[#allocation2 + $0x7f0] sm:$0xff] }
 0x1d5   :  { %v554_v45 = vld [vmem:[#allocation5 + $0x7f0] sm:$0xff] }
 0x1d6   :  { %v1294_v2 = vadd.f32 %v1293_v61, %v1039_v55  ;;  %v798_v55 = vsub.f32 %v286_v48, %v542_v49  ;;  %v1053_v61 = vmul.f32 %v797_v50, %v797_v50  ;;  %v299_v49 = vld [vmem:[#allocation2 + $0x7f8] sm:$0xff] }
 0x1d7   :  { %v555_v50 = vld [vmem:[#allocation5 + $0x7f8] sm:$0xff] }
 0x1d8   :  { %v1295_v7 = vadd.f32 %v1294_v2, %v1040_v60  ;;  %v799_v60 = vsub.f32 %v287_v53, %v543_v54  ;;  %v1054_v2 = vmul.f32 %v798_v55, %v798_v55  ;;  %v811_v54 = vsub.f32 %v299_v49, %v555_v50 }
 0x1da   :  { %v1296_v12 = vadd.f32 %v1295_v7, %v1041_v1  ;;  %v800_v1 = vsub.f32 %v288_v58, %v544_v59  ;;  %v1055_v7 = vmul.f32 %v799_v60, %v799_v60  ;;  %v1067_v59 = vmul.f32 %v811_v54, %v811_v54 }
 0x1dc   :  { %v1297_v17 = vadd.f32 %v1296_v12, %v1042_v6  ;;  %v801_v6 = vsub.f32 %v289_v63, %v545_v0  ;;  %v1056_v12 = vmul.f32 %v800_v1, %v800_v1 }
 0x1de   :  { %v1298_v22 = vadd.f32 %v1297_v17, %v1043_v11  ;;  %v802_v11 = vsub.f32 %v290_v4, %v546_v5  ;;  %v1057_v17 = vmul.f32 %v801_v6, %v801_v6 }
 0x1e0   :  { %v1299_v27 = vadd.f32 %v1298_v22, %v1044_v16  ;;  %v803_v16 = vsub.f32 %v291_v9, %v547_v10  ;;  %v1058_v22 = vmul.f32 %v802_v11, %v802_v11 }
 0x1e2   :  { %v1300_v32 = vadd.f32 %v1299_v27, %v1045_v21  ;;  %v804_v21 = vsub.f32 %v292_v14, %v548_v15  ;;  %v1059_v27 = vmul.f32 %v803_v16, %v803_v16 }
 0x1e4   :  { %v1301_v37 = vadd.f32 %v1300_v32, %v1046_v26  ;;  %v805_v26 = vsub.f32 %v293_v19, %v549_v20  ;;  %v1060_v32 = vmul.f32 %v804_v21, %v804_v21 }
 0x1e6   :  { %v1302_v42 = vadd.f32 %v1301_v37, %v1047_v31  ;;  %v806_v31 = vsub.f32 %v294_v24, %v550_v25  ;;  %v1061_v37 = vmul.f32 %v805_v26, %v805_v26 }
 0x1e8   :  { %v1303_v47 = vadd.f32 %v1302_v42, %v1048_v36  ;;  %v807_v36 = vsub.f32 %v295_v29, %v551_v30  ;;  %v1062_v42 = vmul.f32 %v806_v31, %v806_v31 }
 0x1ea   :  { %v1304_v52 = vadd.f32 %v1303_v47, %v1049_v41  ;;  %v808_v41 = vsub.f32 %v296_v34, %v552_v35  ;;  %v1063_v47 = vmul.f32 %v807_v36, %v807_v36 }
 0x1ec   :  { %v1305_v57 = vadd.f32 %v1304_v52, %v1050_v46  ;;  %v809_v46 = vsub.f32 %v297_v39, %v553_v40  ;;  %v1064_v52 = vmul.f32 %v808_v41, %v808_v41 }
 0x1ee   :  { %v1306_v62 = vadd.f32 %v1305_v57, %v1051_v51  ;;  %v810_v51 = vsub.f32 %v298_v44, %v554_v45  ;;  %v1065_v55 = vmul.f32 %v809_v46, %v809_v46 }
 0x1f0   :  { %v1307_v3 = vadd.f32 %v1306_v62, %v1052_v56  ;;  %v1066_v57 = vmul.f32 %v810_v51, %v810_v51 }
 0x1f2   :  { %v1308_v8 = vadd.f32 %v1307_v3, %v1053_v61 }
 0x1f4   :  { %v1309_v13 = vadd.f32 %v1308_v8, %v1054_v2 }
 0x1f6   :  { %v1310_v18 = vadd.f32 %v1309_v13, %v1055_v7 }
 0x1f8   :  { %v1311_v23 = vadd.f32 %v1310_v18, %v1056_v12 }
 0x1fa   :  { %v1312_v28 = vadd.f32 %v1311_v23, %v1057_v17 }
 0x1fc   :  { %v1313_v33 = vadd.f32 %v1312_v28, %v1058_v22 }
 0x1fe   :  { %v1314_v38 = vadd.f32 %v1313_v33, %v1059_v27 }
 0x200   :  { %v1315_v43 = vadd.f32 %v1314_v38, %v1060_v32 }
 0x202   :  { %v1316_v48 = vadd.f32 %v1315_v43, %v1061_v37 }
 0x204   :  { %v1317_v53 = vadd.f32 %v1316_v48, %v1062_v42 }
 0x206   :  { %v1318_v56 = vadd.f32 %v1317_v53, %v1063_v47 }
 0x208   :  { %v1319_v58 = vadd.f32 %v1318_v56, %v1064_v52 }
 0x20a   :  { %v1320_v60 = vadd.f32 %v1319_v58, %v1065_v55 }
 0x20c   :  { %v1321_v61 = vadd.f32 %v1320_v60, %v1066_v57 }
 0x20e   :  { %v1322_v62 = vadd.f32 %v1321_v61, %v1067_v59 }
 0x210   :  { %1323 = vst [vmem:[#allocation7] sm:$0xff] %v1322_v62 }
 0x211   :  { %1334 = dma.vmem_to_hbm [thread:$0]  %s1330_s1, 128, %s1332_s23, [#allocation4]  }
 0x212   :  { %1423 = dma.done.wait [#allocation4], 128  }
 0x213   :  { %1424 = vsyncadd [#allocation4], 4294967168 }
 0x214   :  { %1339 = vsyncpa [#allocation3], 1 }
 0x215   :  { %1340 = vsyncpa [#allocation6], 1 }
 0x216   :  { %1341 = vsyncpa [#allocation4], 1 }

</bundles_post_ra>
